<compile_context>
chip_gen: v5e
topology: v5e:2x2
jax: 0.10.0
libtpu: 0.0.40
codegen_flags: <defaults>
</compile_context>

<pallas_src>
import functools

import jax
import jax.numpy as jnp
from jax.experimental import pallas as pl
from jax.experimental.pallas import tpu as pltpu

N_INPUT = 32 * 32          # 1024
N_HIDDEN = 64
N_OUTPUT = 1
N_LAYERS = 8
N_HIDDEN_BLOCKS = 1 + (N_LAYERS - 2)   # 7 hidden 64x64 Linear blocks
N_BN = N_HIDDEN_BLOCKS + 1             # 8 BatchNorm1d layers
BN_EPS = 1e-5
FOLD_W = 2 * N_HIDDEN                  # 128: two batch rows folded into one lane-full row
MXU_DTYPE = jnp.bfloat16


def _round_up(x, m):
    return ((x + m - 1) // m) * m


def _cdiv(a, b):
    return -(-a // b)


def _vmem_cap_bytes():
    """Generation-aware VMEM cap (leave 20% headroom for the compiler)."""
    phys = 64 * 1024 * 1024            # conservative default: v7x per-core VMEM
    try:
        info = pltpu.get_tpu_info()
        phys = int(getattr(info, "vmem_capacity_bytes", phys) or phys)
    except Exception:
        pass
    return int(0.8 * phys)


def _vmem_footprint(th, hp):
    """Generous estimate of the kernel's VMEM footprint (bytes)."""
    return (2 * 2 * th * N_INPUT * 4           # x top/bot tiles, double-buffered, f32
            + hp * FOLD_W * 2                  # persistent bf16 folded layer-0 activations
            + 4 * hp * FOLD_W * 4              # stage-2 live f32 temporaries (h, h_next, mask, slack)
            + 2 * hp * 2 * N_OUTPUT * 4        # resident output block
            + 6 * 1024 * 1024)                 # weights (double-buffered) + compiler scratch


def mlp_kernel(x_top_ref, x_bot_ref, w0f_ref, whf_ref, gammaf_ref, betaf_ref,
               woutf_ref, boutf_ref, o_ref, h0_ref, s1_ref, s2_ref,
               *, batch, half_rows, tile):
    """Grid over batch tiles (each step handles `tile` rows of each batch half).

    Every step: folded layer-0 matmul for the tile + incremental BN-0 stats.
    Last step: full-batch BN/ReLU stack + hidden layers + head on the folded layout.
    """
    i = pl.program_id(0)

    @pl.when(i == 0)
    def _():
        s1_ref[...] = jnp.zeros_like(s1_ref)
        s2_ref[...] = jnp.zeros_like(s2_ref)

    # ---- stage 1: folded Linear(1024, 64); x cast to bf16 in VMEM; no bias (cancels in BN) ----
    h = (jnp.dot(x_top_ref[...].astype(MXU_DTYPE), w0f_ref[0],
                 preferred_element_type=jnp.float32)
         + jnp.dot(x_bot_ref[...].astype(MXU_DTYPE), w0f_ref[1],
                   preferred_element_type=jnp.float32))          # (tile, 128) f32
    h_bf = h.astype(MXU_DTYPE)                 # stored values
    h_q = h_bf.astype(jnp.float32)             # stats from the same bf16-rounded values
    s1_ref[...] += jnp.sum(h_q, axis=0, keepdims=True)            # independent reductions,
    s2_ref[...] += jnp.sum(h_q * h_q, axis=0, keepdims=True)      # hidden under the x DMA
    row0 = pl.multiple_of(i * tile, tile)
    h0_ref[pl.ds(row0, tile), :] = h_bf

    # ---- stage 2 (last grid step): full-batch BN stack + head on the folded layout ----
    @pl.when(i == pl.num_programs(0) - 1)
    def _():
        inv_n = jnp.float32(1.0 / batch)

        if 2 * half_rows != batch:
            # Hoisted mask (built once): zero padded batch rows after each BN/ReLU so the
            # next layer's plain sums stay exact.  Folded entry (r, half) <-> batch row
            # r + half*half_rows.
            rows = jax.lax.broadcasted_iota(jnp.int32, (half_rows, FOLD_W), 0)
            lanes = jax.lax.broadcasted_iota(jnp.int32, (half_rows, FOLD_W), 1)
            bidx = rows + jnp.where(lanes >= N_HIDDEN, half_rows, 0)
            mask = (bidx < batch).astype(jnp.float32)
        else:
            mask = None

        def lane_fold(v):
            # combine the two 64-lane halves of a (1,128) stats row; result duplicated per half
            return v + pltpu.roll(v, shift=N_HIDDEN, axis=1)

        def bn_relu(h, s1, s2, idx):
            mean = lane_fold(s1) * inv_n
            var = lane_fold(s2) * inv_n - mean * mean              # biased batch variance
            scale = jax.lax.rsqrt(var + BN_EPS) * gammaf_ref[idx:idx + 1, :]
            shift = betaf_ref[idx:idx + 1, :] - mean * scale
            h = jnp.maximum(h * scale + shift, 0.0)                # f32 VPU math (v5e-safe)
            return h if mask is None else h * mask

        h = bn_relu(h0_ref[...].astype(jnp.float32), s1_ref[...], s2_ref[...], 0)
        for l in range(N_HIDDEN_BLOCKS):
            h = jnp.dot(h.astype(MXU_DTYPE), whf_ref[l],           # block-diag 128x128, no bias
                        preferred_element_type=jnp.float32)
            h = bn_relu(h, jnp.sum(h, axis=0, keepdims=True),
                        jnp.sum(h * h, axis=0, keepdims=True), l + 1)

        # folded head: column 0 = batch rows [0, hp), column 1 = rows [hp, 2*hp)
        o_ref[...] = (jnp.dot(h.astype(MXU_DTYPE), woutf_ref[...],
                              preferred_element_type=jnp.float32) + boutf_ref[...])


def mlp_forward(x, params, *, batch_tile=1024):
    """batch_tile = rows *per batch half* streamed per grid step (2*batch_tile rows/step)."""
    w0, b0, wh, bh, gamma, beta, wout, bout = params
    # b0 / bh cancel exactly in training-mode BatchNorm and are not used by the kernel.
    B = x.shape[0]
    cap = _vmem_cap_bytes()

    th = _round_up(max(16, min(batch_tile, _cdiv(B, 2))), 16)
    while True:
        hp = _round_up(_cdiv(B, 2), th)        # folded rows (= padded batch / 2)
        footprint = _vmem_footprint(th, hp)
        if footprint <= cap or th <= 16:
            break
        th = max(16, _round_up(th // 2, 16))
    if footprint > cap:
        # TODO(synk): implement the tiled two-pass stage-2 BN for batches that do not fit.
        raise ValueError(
            f"batch={B} needs ~{footprint >> 20} MiB resident VMEM (> {cap >> 20} MiB cap); "
            "not supported by the single-pass full-batch-BN kernel.")
    bp = 2 * hp
    num_tiles = hp // th

    if bp != B:                                # only copies x when padding is required
        x = jnp.pad(x, ((0, bp - B), (0, 0)))

    # Folded / zero-padded parameters (tiny, wrapper-side, exact: cross blocks are zero).
    w0_bf = w0.astype(MXU_DTYPE)
    w0f = jnp.zeros((2, N_INPUT, FOLD_W), MXU_DTYPE)
    w0f = w0f.at[0, :, :N_HIDDEN].set(w0_bf).at[1, :, N_HIDDEN:].set(w0_bf)
    wh_bf = wh.astype(MXU_DTYPE)
    whf = jnp.zeros((N_HIDDEN_BLOCKS, FOLD_W, FOLD_W), MXU_DTYPE)
    whf = whf.at[:, :N_HIDDEN, :N_HIDDEN].set(wh_bf).at[:, N_HIDDEN:, N_HIDDEN:].set(wh_bf)
    gammaf = jnp.concatenate([gamma, gamma], axis=1)               # (8, 128) f32
    betaf = jnp.concatenate([beta, beta], axis=1)
    wout_bf = wout.astype(MXU_DTYPE)
    woutf = jnp.zeros((FOLD_W, 2 * N_OUTPUT), MXU_DTYPE)
    woutf = woutf.at[:N_HIDDEN, :N_OUTPUT].set(wout_bf).at[N_HIDDEN:, N_OUTPUT:].set(wout_bf)
    boutf = jnp.concatenate([bout, bout], axis=1)                  # (1, 2) f32

    kernel = functools.partial(mlp_kernel, batch=B, half_rows=hp, tile=th)
    out_folded = pl.pallas_call(
        kernel,
        out_shape=jax.ShapeDtypeStruct((hp, 2 * N_OUTPUT), jnp.float32),
        grid_spec=pltpu.PrefetchScalarGridSpec(
            num_scalar_prefetch=0,
            grid=(num_tiles,),
            in_specs=[
                pl.BlockSpec((th, N_INPUT), lambda i: (i, 0)),                   # x, top half
                pl.BlockSpec((th, N_INPUT), lambda i, n=num_tiles: (i + n, 0)),  # x, bottom half
                pl.BlockSpec((2, N_INPUT, FOLD_W), lambda i: (0, 0, 0)),         # W0 (padded pair)
                pl.BlockSpec((N_HIDDEN_BLOCKS, FOLD_W, FOLD_W),
                             lambda i: (0, 0, 0)),                               # hidden W (blkdiag)
                pl.BlockSpec((N_BN, FOLD_W), lambda i: (0, 0)),                  # gamma (folded)
                pl.BlockSpec((N_BN, FOLD_W), lambda i: (0, 0)),                  # beta (folded)
                pl.BlockSpec((FOLD_W, 2 * N_OUTPUT), lambda i: (0, 0)),          # head W (folded)
                pl.BlockSpec((1, 2 * N_OUTPUT), lambda i: (0, 0)),               # head bias
            ],
            out_specs=pl.BlockSpec((hp, 2 * N_OUTPUT), lambda i: (0, 0)),        # tiny resident out
            scratch_shapes=[
                pltpu.VMEM((hp, FOLD_W), MXU_DTYPE),      # persistent folded layer-0 acts (bf16)
                pltpu.VMEM((1, FOLD_W), jnp.float32),     # running sum(h0)
                pltpu.VMEM((1, FOLD_W), jnp.float32),     # running sum(h0*h0)
            ],
        ),
        compiler_params=pltpu.CompilerParams(
            dimension_semantics=("arbitrary",),           # grid axis carries BN stats + h0 state
            vmem_limit_bytes=min(cap, max(footprint, 32 * 1024 * 1024)),
        ),
    )(x, x, w0f, whf, gammaf, betaf, woutf, boutf)

    # unfold: column block 0 = batch rows [0, hp), column block 1 = rows [hp, 2*hp)
    out = jnp.concatenate([out_folded[:, :N_OUTPUT], out_folded[:, N_OUTPUT:]], axis=0)
    return out[:B]


def mlp_reference(x, params, mxu_dtype=jnp.float32, h0_round_dtype=None):
    """Pure-JAX reference (full PyTorch semantics incl. biases).

    mxu_dtype=bf16 mimics the kernel's MXU operand casts; h0_round_dtype=bf16 additionally
    mimics the kernel's bf16 layer-0 activation scratch (rounded before the bias add, which
    is where the kernel's rounding happens since it drops the bias)."""
    w0, b0, wh, bh, gamma, beta, wout, bout = params

    def mm(a, b):
        return jnp.dot(a.astype(mxu_dtype), b.astype(mxu_dtype),
                       preferred_element_type=jnp.float32)

    def bn_relu(h, idx):
        mean = jnp.mean(h, axis=0, keepdims=True)
        var = jnp.mean(jnp.square(h - mean), axis=0, keepdims=True)
        hn = (h - mean) / jnp.sqrt(var + BN_EPS) * gamma[idx][None, :] + beta[idx][None, :]
        return jnp.maximum(hn, 0.0)

    h = mm(x, w0)
    if h0_round_dtype is not None:
        h = h.astype(h0_round_dtype).astype(jnp.float32)
    h = bn_relu(h + b0, 0)
    for l in range(N_HIDDEN_BLOCKS):
        h = bn_relu(mm(h, wh[l]) + bh[l][None, :], l + 1)
    return mm(h, wout) + bout


def init_params(key):
    """Deterministic init (uniform +-1/sqrt(fan_in), like PyTorch Linear)."""
    ks = jax.random.split(key, 8)

    def lin(k, fan_in, shape):
        bound = 1.0 / jnp.sqrt(fan_in)
        return jax.random.uniform(k, shape, jnp.float32, -bound, bound)

    w0 = lin(ks[0], N_INPUT, (N_INPUT, N_HIDDEN))
    b0 = lin(ks[1], N_INPUT, (1, N_HIDDEN))
    wh = lin(ks[2], N_HIDDEN, (N_HIDDEN_BLOCKS, N_HIDDEN, N_HIDDEN))
    bh = lin(ks[3], N_HIDDEN, (N_HIDDEN_BLOCKS, N_HIDDEN))
    gamma = jnp.ones((N_BN, N_HIDDEN), jnp.float32)   # BN affine init
    beta = jnp.zeros((N_BN, N_HIDDEN), jnp.float32)
    wout = lin(ks[4], N_HIDDEN, (N_HIDDEN, N_OUTPUT))
    bout = lin(ks[5], N_HIDDEN, (1, N_OUTPUT))
    return (w0, b0, wh, bh, gamma, beta, wout, bout)


if __name__ == "__main__":
    key = jax.random.PRNGKey(0)
    k_x, k_x2, k_p = jax.random.split(key, 3)
    params = init_params(k_p)

    # Primary check: small batch, single grid step (padding + masked BN stats exercised).
    B = 8
    x = jax.random.normal(k_x, (B, N_INPUT), jnp.float32)
    out = jax.block_until_ready(mlp_forward(x, params))
    assert out.shape == (B, N_OUTPUT)

    ref_bf16 = mlp_reference(x, params, mxu_dtype=MXU_DTYPE,
                             h0_round_dtype=MXU_DTYPE)             # matches kernel numerics
    ref_f32 = mlp_reference(x, params, mxu_dtype=jnp.float32)      # original f32 semantics
    assert jnp.allclose(out, ref_bf16, atol=5e-3, rtol=5e-3), (out, ref_bf16)
    assert jnp.allclose(out, ref_f32, atol=1e-1, rtol=1e-1), (out, ref_f32)

    # Secondary check: multiple grid steps + batch padding (exercises the tiled, folded
    # layer-0 pipeline, incremental stats accumulation and the hoisted padding mask).
    B2 = 72
    x2 = jax.random.normal(k_x2, (B2, N_INPUT), jnp.float32)
    out2 = jax.block_until_ready(mlp_forward(x2, params, batch_tile=16))
    ref2 = mlp_reference(x2, params, mxu_dtype=MXU_DTYPE, h0_round_dtype=MXU_DTYPE)
    assert out2.shape == (B2, N_OUTPUT)
    assert jnp.allclose(out2, ref2, atol=5e-3, rtol=5e-3), (out2, ref2)

    print("KERNEL_OK")
</pallas_src>

<mosaic_0001>
module attributes {stable_mosaic.version = 11 : i64} {
  func.func @mlp_kernel(%arg0: i32, %arg1: memref<16x1024xf32, #tpu.memory_space<vmem>>, %arg2: memref<16x1024xf32, #tpu.memory_space<vmem>>, %arg3: memref<2x1024x128xbf16, #tpu.memory_space<vmem>>, %arg4: memref<7x128x128xbf16, #tpu.memory_space<vmem>>, %arg5: memref<8x128xf32, #tpu.memory_space<vmem>>, %arg6: memref<8x128xf32, #tpu.memory_space<vmem>>, %arg7: memref<128x2xbf16, #tpu.memory_space<vmem>>, %arg8: memref<1x2xf32, #tpu.memory_space<vmem>>, %arg9: memref<16x2xf32, #tpu.memory_space<vmem>>, %arg10: memref<16x128xbf16, #tpu.memory_space<vmem>>, %arg11: memref<1x128xf32, #tpu.memory_space<vmem>>, %arg12: memref<1x128xf32, #tpu.memory_space<vmem>>) attributes {dimension_semantics = [#tpu.dimension_semantics<arbitrary>], iteration_bounds = array<i64: 1>, scalar_prefetch = 0 : i64, scratch_operands = 3 : i64, tpu.core_type = #tpu.core_type<tc>, window_params = [{transform_indices = @transform_0, window_bounds = array<i64: 16, 1024>}, {transform_indices = @transform_1, window_bounds = array<i64: 16, 1024>}, {pipeline_mode = #tpu.pipeline_mode<synchronous>, transform_indices = @transform_2, window_bounds = array<i64: 2, 1024, 128>}, {pipeline_mode = #tpu.pipeline_mode<synchronous>, transform_indices = @transform_3, window_bounds = array<i64: 7, 128, 128>}, {pipeline_mode = #tpu.pipeline_mode<synchronous>, transform_indices = @transform_4, window_bounds = array<i64: 8, 128>}, {pipeline_mode = #tpu.pipeline_mode<synchronous>, transform_indices = @transform_5, window_bounds = array<i64: 8, 128>}, {pipeline_mode = #tpu.pipeline_mode<synchronous>, transform_indices = @transform_6, window_bounds = array<i64: 128, 2>}, {pipeline_mode = #tpu.pipeline_mode<synchronous>, transform_indices = @transform_7, window_bounds = array<i64: 1, 2>}, {pipeline_mode = #tpu.pipeline_mode<synchronous>, transform_indices = @transform_8, window_bounds = array<i64: 16, 2>}]} {
    %c0_i32 = arith.constant 0 : i32
    %0 = arith.cmpi eq, %arg0, %c0_i32 : i32
    %1 = arith.extui %0 : i1 to i32
    %c0_i32_0 = arith.constant 0 : i32
    %2 = arith.cmpi ne, %1, %c0_i32_0 : i32
    scf.if %2 {
      %cst_23 = arith.constant 0.000000e+00 : f32
      %34 = vector.broadcast %cst_23 : f32 to vector<1x128xf32>
      %c0_24 = arith.constant 0 : index
      %c0_25 = arith.constant 0 : index
      %35 = vector.load %arg11[%c0_24, %c0_25] : memref<1x128xf32, #tpu.memory_space<vmem>>, vector<1x128xf32>
      tpu.vector_store %arg11[%c0_24, %c0_25], %34 {strides = array<i32>} : memref<1x128xf32, #tpu.memory_space<vmem>>, vector<1x128xf32>,
      %cst_26 = arith.constant 0.000000e+00 : f32
      %36 = vector.broadcast %cst_26 : f32 to vector<1x128xf32>
      %c0_27 = arith.constant 0 : index
      %c0_28 = arith.constant 0 : index
      %37 = vector.load %arg12[%c0_27, %c0_28] : memref<1x128xf32, #tpu.memory_space<vmem>>, vector<1x128xf32>
      tpu.vector_store %arg12[%c0_27, %c0_28], %36 {strides = array<i32>} : memref<1x128xf32, #tpu.memory_space<vmem>>, vector<1x128xf32>,
    } else {
    }
    %c0 = arith.constant 0 : index
    %c0_1 = arith.constant 0 : index
    %3 = vector.load %arg1[%c0, %c0_1] : memref<16x1024xf32, #tpu.memory_space<vmem>>, vector<16x1024xf32>
    %4 = arith.truncf %3 : vector<16x1024xf32> to vector<16x1024xbf16>
    %c0_2 = arith.constant 0 : index
    %c0_3 = arith.constant 0 : index
    %c0_4 = arith.constant 0 : index
    %5 = vector.load %arg3[%c0_2, %c0_3, %c0_4] : memref<2x1024x128xbf16, #tpu.memory_space<vmem>>, vector<1x1024x128xbf16>
    %6 = vector.shape_cast %5 : vector<1x1024x128xbf16> to vector<1024x128xbf16>
    %cst = arith.constant dense<0.000000e+00> : vector<16x128xf32>
    %7 = tpu.matmul %4, %6, %cst {dimension_numbers = #tpu.dot_dimension_numbers<[1], [0], [0], [1], [0, 0, 1, 1], [], []>} : vector<16x1024xbf16>, vector<1024x128xbf16>, vector<16x128xf32> -> vector<16x128xf32>
    %c0_5 = arith.constant 0 : index
    %c0_6 = arith.constant 0 : index
    %8 = vector.load %arg2[%c0_5, %c0_6] : memref<16x1024xf32, #tpu.memory_space<vmem>>, vector<16x1024xf32>
    %9 = arith.truncf %8 : vector<16x1024xf32> to vector<16x1024xbf16>
    %c1 = arith.constant 1 : index
    %c0_7 = arith.constant 0 : index
    %c0_8 = arith.constant 0 : index
    %10 = vector.load %arg3[%c1, %c0_7, %c0_8] : memref<2x1024x128xbf16, #tpu.memory_space<vmem>>, vector<1x1024x128xbf16>
    %11 = vector.shape_cast %10 : vector<1x1024x128xbf16> to vector<1024x128xbf16>
    %cst_9 = arith.constant dense<0.000000e+00> : vector<16x128xf32>
    %12 = tpu.matmul %9, %11, %cst_9 {dimension_numbers = #tpu.dot_dimension_numbers<[1], [0], [0], [1], [0, 0, 1, 1], [], []>} : vector<16x1024xbf16>, vector<1024x128xbf16>, vector<16x128xf32> -> vector<16x128xf32>
    %13 = arith.addf %7, %12 : vector<16x128xf32>
    %14 = arith.truncf %13 : vector<16x128xf32> to vector<16x128xbf16>
    %15 = arith.extf %14 : vector<16x128xbf16> to vector<16x128xf32>
    %c0_10 = arith.constant 0 : index
    %c0_11 = arith.constant 0 : index
    %16 = vector.load %arg11[%c0_10, %c0_11] : memref<1x128xf32, #tpu.memory_space<vmem>>, vector<1x128xf32>
    %cst_12 = arith.constant dense<0.000000e+00> : vector<128xf32>
    %17 = vector.multi_reduction <add>, %15, %cst_12 [0] : vector<16x128xf32> to vector<128xf32>
    %18 = vector.shape_cast %17 : vector<128xf32> to vector<1x128xf32>
    %19 = arith.addf %16, %18 : vector<1x128xf32>
    %c0_13 = arith.constant 0 : index
    %c0_14 = arith.constant 0 : index
    %20 = vector.load %arg11[%c0_13, %c0_14] : memref<1x128xf32, #tpu.memory_space<vmem>>, vector<1x128xf32>
    tpu.vector_store %arg11[%c0_13, %c0_14], %19 {strides = array<i32>} : memref<1x128xf32, #tpu.memory_space<vmem>>, vector<1x128xf32>,
    %c0_15 = arith.constant 0 : index
    %c0_16 = arith.constant 0 : index
    %21 = vector.load %arg12[%c0_15, %c0_16] : memref<1x128xf32, #tpu.memory_space<vmem>>, vector<1x128xf32>
    %22 = arith.mulf %15, %15 : vector<16x128xf32>
    %cst_17 = arith.constant dense<0.000000e+00> : vector<128xf32>
    %23 = vector.multi_reduction <add>, %22, %cst_17 [0] : vector<16x128xf32> to vector<128xf32>
    %24 = vector.shape_cast %23 : vector<128xf32> to vector<1x128xf32>
    %25 = arith.addf %21, %24 : vector<1x128xf32>
    %c0_18 = arith.constant 0 : index
    %c0_19 = arith.constant 0 : index
    %26 = vector.load %arg12[%c0_18, %c0_19] : memref<1x128xf32, #tpu.memory_space<vmem>>, vector<1x128xf32>
    tpu.vector_store %arg12[%c0_18, %c0_19], %25 {strides = array<i32>} : memref<1x128xf32, #tpu.memory_space<vmem>>, vector<1x128xf32>,
    %c16_i32 = arith.constant 16 : i32
    %27 = arith.muli %arg0, %c16_i32 : i32
    %28 = tpu.assume_multiple %27, 16 : i32
    %29 = arith.index_cast %28 : i32 to index
    %c0_20 = arith.constant 0 : index
    %30 = vector.load %arg10[%29, %c0_20] : memref<16x128xbf16, #tpu.memory_space<vmem>>, vector<16x128xbf16>
    tpu.vector_store %arg10[%29, %c0_20], %14 {strides = array<i32>} : memref<16x128xbf16, #tpu.memory_space<vmem>>, vector<16x128xbf16>,
    %c0_i32_21 = arith.constant 0 : i32
    %31 = arith.cmpi eq, %arg0, %c0_i32_21 : i32
    %32 = arith.extui %31 : i1 to i32
    %c0_i32_22 = arith.constant 0 : i32
    %33 = arith.cmpi ne, %32, %c0_i32_22 : i32
    scf.if %33 {
      %34 = tpu.iota {dimensions = array<i32: 0>} : vector<16x128xi32>
      %35 = tpu.iota {dimensions = array<i32: 1>} : vector<16x128xi32>
      %c64_i32 = arith.constant 64 : i32
      %36 = vector.broadcast %c64_i32 : i32 to vector<16x128xi32>
      %37 = arith.cmpi sge, %35, %36 : vector<16x128xi32>
      %c16_i32_23 = arith.constant 16 : i32
      %c0_i32_24 = arith.constant 0 : i32
      %38 = vector.broadcast %c16_i32_23 : i32 to vector<16x128xi32>
      %39 = vector.broadcast %c0_i32_24 : i32 to vector<16x128xi32>
      %40 = arith.select %37, %38, %39 : vector<16x128xi1>, vector<16x128xi32>
      %41 = arith.addi %34, %40 : vector<16x128xi32>
      %c8_i32 = arith.constant 8 : i32
      %42 = vector.broadcast %c8_i32 : i32 to vector<16x128xi32>
      %43 = arith.cmpi slt, %41, %42 : vector<16x128xi32>
      %44 = arith.extui %43 : vector<16x128xi1> to vector<16x128xi32>
      %45 = arith.sitofp %44 : vector<16x128xi32> to vector<16x128xf32>
      %c0_25 = arith.constant 0 : index
      %c0_26 = arith.constant 0 : index
      %46 = vector.load %arg10[%c0_25, %c0_26] : memref<16x128xbf16, #tpu.memory_space<vmem>>, vector<16x128xbf16>
      %47 = arith.extf %46 : vector<16x128xbf16> to vector<16x128xf32>
      %c0_27 = arith.constant 0 : index
      %c0_28 = arith.constant 0 : index
      %48 = vector.load %arg11[%c0_27, %c0_28] : memref<1x128xf32, #tpu.memory_space<vmem>>, vector<1x128xf32>
      %c0_29 = arith.constant 0 : index
      %c0_30 = arith.constant 0 : index
      %49 = vector.load %arg12[%c0_29, %c0_30] : memref<1x128xf32, #tpu.memory_space<vmem>>, vector<1x128xf32>
      %c64_i32_31 = arith.constant 64 : i32
      %50 = tpu.dynamic_rotate %48 by %c64_i32_31 dim 1 : vector<1x128xf32>, i32 -> vector<1x128xf32>
      %51 = arith.addf %48, %50 : vector<1x128xf32>
      %cst_32 = arith.constant 1.250000e-01 : f32
      %52 = vector.broadcast %cst_32 : f32 to vector<1x128xf32>
      %53 = arith.mulf %51, %52 : vector<1x128xf32>
      %c64_i32_33 = arith.constant 64 : i32
      %54 = tpu.dynamic_rotate %49 by %c64_i32_33 dim 1 : vector<1x128xf32>, i32 -> vector<1x128xf32>
      %55 = arith.addf %49, %54 : vector<1x128xf32>
      %cst_34 = arith.constant 1.250000e-01 : f32
      %56 = vector.broadcast %cst_34 : f32 to vector<1x128xf32>
      %57 = arith.mulf %55, %56 : vector<1x128xf32>
      %58 = arith.mulf %53, %53 : vector<1x128xf32>
      %59 = arith.subf %57, %58 : vector<1x128xf32>
      %cst_35 = arith.constant 9.99999974E-6 : f32
      %60 = vector.broadcast %cst_35 : f32 to vector<1x128xf32>
      %61 = arith.addf %59, %60 : vector<1x128xf32>
      %62 = math.rsqrt %61 : vector<1x128xf32>
      %c0_36 = arith.constant 0 : index
      %c0_37 = arith.constant 0 : index
      %63 = vector.load %arg5[%c0_36, %c0_37] : memref<8x128xf32, #tpu.memory_space<vmem>>, vector<1x128xf32>
      %64 = arith.mulf %62, %63 : vector<1x128xf32>
      %c0_38 = arith.constant 0 : index
      %c0_39 = arith.constant 0 : index
      %65 = vector.load %arg6[%c0_38, %c0_39] : memref<8x128xf32, #tpu.memory_space<vmem>>, vector<1x128xf32>
      %66 = arith.mulf %53, %64 : vector<1x128xf32>
      %67 = arith.subf %65, %66 : vector<1x128xf32>
      %68 = vector.broadcast %64 : vector<1x128xf32> to vector<16x128xf32>
      %69 = arith.mulf %47, %68 : vector<16x128xf32>
      %70 = vector.broadcast %67 : vector<1x128xf32> to vector<16x128xf32>
      %71 = arith.addf %69, %70 : vector<16x128xf32>
      %cst_40 = arith.constant 0.000000e+00 : f32
      %72 = vector.broadcast %cst_40 : f32 to vector<16x128xf32>
      %73 = arith.maximumf %71, %72 : vector<16x128xf32>
      %74 = arith.mulf %73, %45 : vector<16x128xf32>
      %75 = arith.truncf %74 : vector<16x128xf32> to vector<16x128xbf16>
      %c0_41 = arith.constant 0 : index
      %c0_42 = arith.constant 0 : index
      %c0_43 = arith.constant 0 : index
      %76 = vector.load %arg4[%c0_41, %c0_42, %c0_43] : memref<7x128x128xbf16, #tpu.memory_space<vmem>>, vector<1x128x128xbf16>
      %77 = vector.shape_cast %76 : vector<1x128x128xbf16> to vector<128x128xbf16>
      %cst_44 = arith.constant dense<0.000000e+00> : vector<16x128xf32>
      %78 = tpu.matmul %75, %77, %cst_44 {dimension_numbers = #tpu.dot_dimension_numbers<[1], [0], [0], [1], [0, 0, 1, 1], [], []>} : vector<16x128xbf16>, vector<128x128xbf16>, vector<16x128xf32> -> vector<16x128xf32>
      %cst_45 = arith.constant dense<0.000000e+00> : vector<128xf32>
      %79 = vector.multi_reduction <add>, %78, %cst_45 [0] : vector<16x128xf32> to vector<128xf32>
      %80 = vector.shape_cast %79 : vector<128xf32> to vector<1x128xf32>
      %81 = arith.mulf %78, %78 : vector<16x128xf32>
      %cst_46 = arith.constant dense<0.000000e+00> : vector<128xf32>
      %82 = vector.multi_reduction <add>, %81, %cst_46 [0] : vector<16x128xf32> to vector<128xf32>
      %83 = vector.shape_cast %82 : vector<128xf32> to vector<1x128xf32>
      %c64_i32_47 = arith.constant 64 : i32
      %84 = tpu.dynamic_rotate %80 by %c64_i32_47 dim 1 : vector<1x128xf32>, i32 -> vector<1x128xf32>
      %85 = arith.addf %80, %84 : vector<1x128xf32>
      %cst_48 = arith.constant 1.250000e-01 : f32
      %86 = vector.broadcast %cst_48 : f32 to vector<1x128xf32>
      %87 = arith.mulf %85, %86 : vector<1x128xf32>
      %c64_i32_49 = arith.constant 64 : i32
      %88 = tpu.dynamic_rotate %83 by %c64_i32_49 dim 1 : vector<1x128xf32>, i32 -> vector<1x128xf32>
      %89 = arith.addf %83, %88 : vector<1x128xf32>
      %cst_50 = arith.constant 1.250000e-01 : f32
      %90 = vector.broadcast %cst_50 : f32 to vector<1x128xf32>
      %91 = arith.mulf %89, %90 : vector<1x128xf32>
      %92 = arith.mulf %87, %87 : vector<1x128xf32>
      %93 = arith.subf %91, %92 : vector<1x128xf32>
      %cst_51 = arith.constant 9.99999974E-6 : f32
      %94 = vector.broadcast %cst_51 : f32 to vector<1x128xf32>
      %95 = arith.addf %93, %94 : vector<1x128xf32>
      %96 = math.rsqrt %95 : vector<1x128xf32>
      %c1_52 = arith.constant 1 : index
      %c0_53 = arith.constant 0 : index
      %97 = vector.load %arg5[%c1_52, %c0_53] : memref<8x128xf32, #tpu.memory_space<vmem>>, vector<1x128xf32>
      %98 = arith.mulf %96, %97 : vector<1x128xf32>
      %c1_54 = arith.constant 1 : index
      %c0_55 = arith.constant 0 : index
      %99 = vector.load %arg6[%c1_54, %c0_55] : memref<8x128xf32, #tpu.memory_space<vmem>>, vector<1x128xf32>
      %100 = arith.mulf %87, %98 : vector<1x128xf32>
      %101 = arith.subf %99, %100 : vector<1x128xf32>
      %102 = vector.broadcast %98 : vector<1x128xf32> to vector<16x128xf32>
      %103 = arith.mulf %78, %102 : vector<16x128xf32>
      %104 = vector.broadcast %101 : vector<1x128xf32> to vector<16x128xf32>
      %105 = arith.addf %103, %104 : vector<16x128xf32>
      %cst_56 = arith.constant 0.000000e+00 : f32
      %106 = vector.broadcast %cst_56 : f32 to vector<16x128xf32>
      %107 = arith.maximumf %105, %106 : vector<16x128xf32>
      %108 = arith.mulf %107, %45 : vector<16x128xf32>
      %109 = arith.truncf %108 : vector<16x128xf32> to vector<16x128xbf16>
      %c1_57 = arith.constant 1 : index
      %c0_58 = arith.constant 0 : index
      %c0_59 = arith.constant 0 : index
      %110 = vector.load %arg4[%c1_57, %c0_58, %c0_59] : memref<7x128x128xbf16, #tpu.memory_space<vmem>>, vector<1x128x128xbf16>
      %111 = vector.shape_cast %110 : vector<1x128x128xbf16> to vector<128x128xbf16>
      %cst_60 = arith.constant dense<0.000000e+00> : vector<16x128xf32>
      %112 = tpu.matmul %109, %111, %cst_60 {dimension_numbers = #tpu.dot_dimension_numbers<[1], [0], [0], [1], [0, 0, 1, 1], [], []>} : vector<16x128xbf16>, vector<128x128xbf16>, vector<16x128xf32> -> vector<16x128xf32>
      %cst_61 = arith.constant dense<0.000000e+00> : vector<128xf32>
      %113 = vector.multi_reduction <add>, %112, %cst_61 [0] : vector<16x128xf32> to vector<128xf32>
      %114 = vector.shape_cast %113 : vector<128xf32> to vector<1x128xf32>
      %115 = arith.mulf %112, %112 : vector<16x128xf32>
      %cst_62 = arith.constant dense<0.000000e+00> : vector<128xf32>
      %116 = vector.multi_reduction <add>, %115, %cst_62 [0] : vector<16x128xf32> to vector<128xf32>
      %117 = vector.shape_cast %116 : vector<128xf32> to vector<1x128xf32>
      %c64_i32_63 = arith.constant 64 : i32
      %118 = tpu.dynamic_rotate %114 by %c64_i32_63 dim 1 : vector<1x128xf32>, i32 -> vector<1x128xf32>
      %119 = arith.addf %114, %118 : vector<1x128xf32>
      %cst_64 = arith.constant 1.250000e-01 : f32
      %120 = vector.broadcast %cst_64 : f32 to vector<1x128xf32>
      %121 = arith.mulf %119, %120 : vector<1x128xf32>
      %c64_i32_65 = arith.constant 64 : i32
      %122 = tpu.dynamic_rotate %117 by %c64_i32_65 dim 1 : vector<1x128xf32>, i32 -> vector<1x128xf32>
      %123 = arith.addf %117, %122 : vector<1x128xf32>
      %cst_66 = arith.constant 1.250000e-01 : f32
      %124 = vector.broadcast %cst_66 : f32 to vector<1x128xf32>
      %125 = arith.mulf %123, %124 : vector<1x128xf32>
      %126 = arith.mulf %121, %121 : vector<1x128xf32>
      %127 = arith.subf %125, %126 : vector<1x128xf32>
      %cst_67 = arith.constant 9.99999974E-6 : f32
      %128 = vector.broadcast %cst_67 : f32 to vector<1x128xf32>
      %129 = arith.addf %127, %128 : vector<1x128xf32>
      %130 = math.rsqrt %129 : vector<1x128xf32>
      %c2 = arith.constant 2 : index
      %c0_68 = arith.constant 0 : index
      %131 = vector.load %arg5[%c2, %c0_68] : memref<8x128xf32, #tpu.memory_space<vmem>>, vector<1x128xf32>
      %132 = arith.mulf %130, %131 : vector<1x128xf32>
      %c2_69 = arith.constant 2 : index
      %c0_70 = arith.constant 0 : index
      %133 = vector.load %arg6[%c2_69, %c0_70] : memref<8x128xf32, #tpu.memory_space<vmem>>, vector<1x128xf32>
      %134 = arith.mulf %121, %132 : vector<1x128xf32>
      %135 = arith.subf %133, %134 : vector<1x128xf32>
      %136 = vector.broadcast %132 : vector<1x128xf32> to vector<16x128xf32>
      %137 = arith.mulf %112, %136 : vector<16x128xf32>
      %138 = vector.broadcast %135 : vector<1x128xf32> to vector<16x128xf32>
      %139 = arith.addf %137, %138 : vector<16x128xf32>
      %cst_71 = arith.constant 0.000000e+00 : f32
      %140 = vector.broadcast %cst_71 : f32 to vector<16x128xf32>
      %141 = arith.maximumf %139, %140 : vector<16x128xf32>
      %142 = arith.mulf %141, %45 : vector<16x128xf32>
      %143 = arith.truncf %142 : vector<16x128xf32> to vector<16x128xbf16>
      %c2_72 = arith.constant 2 : index
      %c0_73 = arith.constant 0 : index
      %c0_74 = arith.constant 0 : index
      %144 = vector.load %arg4[%c2_72, %c0_73, %c0_74] : memref<7x128x128xbf16, #tpu.memory_space<vmem>>, vector<1x128x128xbf16>
      %145 = vector.shape_cast %144 : vector<1x128x128xbf16> to vector<128x128xbf16>
      %cst_75 = arith.constant dense<0.000000e+00> : vector<16x128xf32>
      %146 = tpu.matmul %143, %145, %cst_75 {dimension_numbers = #tpu.dot_dimension_numbers<[1], [0], [0], [1], [0, 0, 1, 1], [], []>} : vector<16x128xbf16>, vector<128x128xbf16>, vector<16x128xf32> -> vector<16x128xf32>
      %cst_76 = arith.constant dense<0.000000e+00> : vector<128xf32>
      %147 = vector.multi_reduction <add>, %146, %cst_76 [0] : vector<16x128xf32> to vector<128xf32>
      %148 = vector.shape_cast %147 : vector<128xf32> to vector<1x128xf32>
      %149 = arith.mulf %146, %146 : vector<16x128xf32>
      %cst_77 = arith.constant dense<0.000000e+00> : vector<128xf32>
      %150 = vector.multi_reduction <add>, %149, %cst_77 [0] : vector<16x128xf32> to vector<128xf32>
      %151 = vector.shape_cast %150 : vector<128xf32> to vector<1x128xf32>
      %c64_i32_78 = arith.constant 64 : i32
      %152 = tpu.dynamic_rotate %148 by %c64_i32_78 dim 1 : vector<1x128xf32>, i32 -> vector<1x128xf32>
      %153 = arith.addf %148, %152 : vector<1x128xf32>
      %cst_79 = arith.constant 1.250000e-01 : f32
      %154 = vector.broadcast %cst_79 : f32 to vector<1x128xf32>
      %155 = arith.mulf %153, %154 : vector<1x128xf32>
      %c64_i32_80 = arith.constant 64 : i32
      %156 = tpu.dynamic_rotate %151 by %c64_i32_80 dim 1 : vector<1x128xf32>, i32 -> vector<1x128xf32>
      %157 = arith.addf %151, %156 : vector<1x128xf32>
      %cst_81 = arith.constant 1.250000e-01 : f32
      %158 = vector.broadcast %cst_81 : f32 to vector<1x128xf32>
      %159 = arith.mulf %157, %158 : vector<1x128xf32>
      %160 = arith.mulf %155, %155 : vector<1x128xf32>
      %161 = arith.subf %159, %160 : vector<1x128xf32>
      %cst_82 = arith.constant 9.99999974E-6 : f32
      %162 = vector.broadcast %cst_82 : f32 to vector<1x128xf32>
      %163 = arith.addf %161, %162 : vector<1x128xf32>
      %164 = math.rsqrt %163 : vector<1x128xf32>
      %c3 = arith.constant 3 : index
      %c0_83 = arith.constant 0 : index
      %165 = vector.load %arg5[%c3, %c0_83] : memref<8x128xf32, #tpu.memory_space<vmem>>, vector<1x128xf32>
      %166 = arith.mulf %164, %165 : vector<1x128xf32>
      %c3_84 = arith.constant 3 : index
      %c0_85 = arith.constant 0 : index
      %167 = vector.load %arg6[%c3_84, %c0_85] : memref<8x128xf32, #tpu.memory_space<vmem>>, vector<1x128xf32>
      %168 = arith.mulf %155, %166 : vector<1x128xf32>
      %169 = arith.subf %167, %168 : vector<1x128xf32>
      %170 = vector.broadcast %166 : vector<1x128xf32> to vector<16x128xf32>
      %171 = arith.mulf %146, %170 : vector<16x128xf32>
      %172 = vector.broadcast %169 : vector<1x128xf32> to vector<16x128xf32>
      %173 = arith.addf %171, %172 : vector<16x128xf32>
      %cst_86 = arith.constant 0.000000e+00 : f32
      %174 = vector.broadcast %cst_86 : f32 to vector<16x128xf32>
      %175 = arith.maximumf %173, %174 : vector<16x128xf32>
      %176 = arith.mulf %175, %45 : vector<16x128xf32>
      %177 = arith.truncf %176 : vector<16x128xf32> to vector<16x128xbf16>
      %c3_87 = arith.constant 3 : index
      %c0_88 = arith.constant 0 : index
      %c0_89 = arith.constant 0 : index
      %178 = vector.load %arg4[%c3_87, %c0_88, %c0_89] : memref<7x128x128xbf16, #tpu.memory_space<vmem>>, vector<1x128x128xbf16>
      %179 = vector.shape_cast %178 : vector<1x128x128xbf16> to vector<128x128xbf16>
      %cst_90 = arith.constant dense<0.000000e+00> : vector<16x128xf32>
      %180 = tpu.matmul %177, %179, %cst_90 {dimension_numbers = #tpu.dot_dimension_numbers<[1], [0], [0], [1], [0, 0, 1, 1], [], []>} : vector<16x128xbf16>, vector<128x128xbf16>, vector<16x128xf32> -> vector<16x128xf32>
      %cst_91 = arith.constant dense<0.000000e+00> : vector<128xf32>
      %181 = vector.multi_reduction <add>, %180, %cst_91 [0] : vector<16x128xf32> to vector<128xf32>
      %182 = vector.shape_cast %181 : vector<128xf32> to vector<1x128xf32>
      %183 = arith.mulf %180, %180 : vector<16x128xf32>
      %cst_92 = arith.constant dense<0.000000e+00> : vector<128xf32>
      %184 = vector.multi_reduction <add>, %183, %cst_92 [0] : vector<16x128xf32> to vector<128xf32>
      %185 = vector.shape_cast %184 : vector<128xf32> to vector<1x128xf32>
      %c64_i32_93 = arith.constant 64 : i32
      %186 = tpu.dynamic_rotate %182 by %c64_i32_93 dim 1 : vector<1x128xf32>, i32 -> vector<1x128xf32>
      %187 = arith.addf %182, %186 : vector<1x128xf32>
      %cst_94 = arith.constant 1.250000e-01 : f32
      %188 = vector.broadcast %cst_94 : f32 to vector<1x128xf32>
      %189 = arith.mulf %187, %188 : vector<1x128xf32>
      %c64_i32_95 = arith.constant 64 : i32
      %190 = tpu.dynamic_rotate %185 by %c64_i32_95 dim 1 : vector<1x128xf32>, i32 -> vector<1x128xf32>
      %191 = arith.addf %185, %190 : vector<1x128xf32>
      %cst_96 = arith.constant 1.250000e-01 : f32
      %192 = vector.broadcast %cst_96 : f32 to vector<1x128xf32>
      %193 = arith.mulf %191, %192 : vector<1x128xf32>
      %194 = arith.mulf %189, %189 : vector<1x128xf32>
      %195 = arith.subf %193, %194 : vector<1x128xf32>
      %cst_97 = arith.constant 9.99999974E-6 : f32
      %196 = vector.broadcast %cst_97 : f32 to vector<1x128xf32>
      %197 = arith.addf %195, %196 : vector<1x128xf32>
      %198 = math.rsqrt %197 : vector<1x128xf32>
      %c4 = arith.constant 4 : index
      %c0_98 = arith.constant 0 : index
      %199 = vector.load %arg5[%c4, %c0_98] : memref<8x128xf32, #tpu.memory_space<vmem>>, vector<1x128xf32>
      %200 = arith.mulf %198, %199 : vector<1x128xf32>
      %c4_99 = arith.constant 4 : index
      %c0_100 = arith.constant 0 : index
      %201 = vector.load %arg6[%c4_99, %c0_100] : memref<8x128xf32, #tpu.memory_space<vmem>>, vector<1x128xf32>
      %202 = arith.mulf %189, %200 : vector<1x128xf32>
      %203 = arith.subf %201, %202 : vector<1x128xf32>
      %204 = vector.broadcast %200 : vector<1x128xf32> to vector<16x128xf32>
      %205 = arith.mulf %180, %204 : vector<16x128xf32>
      %206 = vector.broadcast %203 : vector<1x128xf32> to vector<16x128xf32>
      %207 = arith.addf %205, %206 : vector<16x128xf32>
      %cst_101 = arith.constant 0.000000e+00 : f32
      %208 = vector.broadcast %cst_101 : f32 to vector<16x128xf32>
      %209 = arith.maximumf %207, %208 : vector<16x128xf32>
      %210 = arith.mulf %209, %45 : vector<16x128xf32>
      %211 = arith.truncf %210 : vector<16x128xf32> to vector<16x128xbf16>
      %c4_102 = arith.constant 4 : index
      %c0_103 = arith.constant 0 : index
      %c0_104 = arith.constant 0 : index
      %212 = vector.load %arg4[%c4_102, %c0_103, %c0_104] : memref<7x128x128xbf16, #tpu.memory_space<vmem>>, vector<1x128x128xbf16>
      %213 = vector.shape_cast %212 : vector<1x128x128xbf16> to vector<128x128xbf16>
      %cst_105 = arith.constant dense<0.000000e+00> : vector<16x128xf32>
      %214 = tpu.matmul %211, %213, %cst_105 {dimension_numbers = #tpu.dot_dimension_numbers<[1], [0], [0], [1], [0, 0, 1, 1], [], []>} : vector<16x128xbf16>, vector<128x128xbf16>, vector<16x128xf32> -> vector<16x128xf32>
      %cst_106 = arith.constant dense<0.000000e+00> : vector<128xf32>
      %215 = vector.multi_reduction <add>, %214, %cst_106 [0] : vector<16x128xf32> to vector<128xf32>
      %216 = vector.shape_cast %215 : vector<128xf32> to vector<1x128xf32>
      %217 = arith.mulf %214, %214 : vector<16x128xf32>
      %cst_107 = arith.constant dense<0.000000e+00> : vector<128xf32>
      %218 = vector.multi_reduction <add>, %217, %cst_107 [0] : vector<16x128xf32> to vector<128xf32>
      %219 = vector.shape_cast %218 : vector<128xf32> to vector<1x128xf32>
      %c64_i32_108 = arith.constant 64 : i32
      %220 = tpu.dynamic_rotate %216 by %c64_i32_108 dim 1 : vector<1x128xf32>, i32 -> vector<1x128xf32>
      %221 = arith.addf %216, %220 : vector<1x128xf32>
      %cst_109 = arith.constant 1.250000e-01 : f32
      %222 = vector.broadcast %cst_109 : f32 to vector<1x128xf32>
      %223 = arith.mulf %221, %222 : vector<1x128xf32>
      %c64_i32_110 = arith.constant 64 : i32
      %224 = tpu.dynamic_rotate %219 by %c64_i32_110 dim 1 : vector<1x128xf32>, i32 -> vector<1x128xf32>
      %225 = arith.addf %219, %224 : vector<1x128xf32>
      %cst_111 = arith.constant 1.250000e-01 : f32
      %226 = vector.broadcast %cst_111 : f32 to vector<1x128xf32>
      %227 = arith.mulf %225, %226 : vector<1x128xf32>
      %228 = arith.mulf %223, %223 : vector<1x128xf32>
      %229 = arith.subf %227, %228 : vector<1x128xf32>
      %cst_112 = arith.constant 9.99999974E-6 : f32
      %230 = vector.broadcast %cst_112 : f32 to vector<1x128xf32>
      %231 = arith.addf %229, %230 : vector<1x128xf32>
      %232 = math.rsqrt %231 : vector<1x128xf32>
      %c5 = arith.constant 5 : index
      %c0_113 = arith.constant 0 : index
      %233 = vector.load %arg5[%c5, %c0_113] : memref<8x128xf32, #tpu.memory_space<vmem>>, vector<1x128xf32>
      %234 = arith.mulf %232, %233 : vector<1x128xf32>
      %c5_114 = arith.constant 5 : index
      %c0_115 = arith.constant 0 : index
      %235 = vector.load %arg6[%c5_114, %c0_115] : memref<8x128xf32, #tpu.memory_space<vmem>>, vector<1x128xf32>
      %236 = arith.mulf %223, %234 : vector<1x128xf32>
      %237 = arith.subf %235, %236 : vector<1x128xf32>
      %238 = vector.broadcast %234 : vector<1x128xf32> to vector<16x128xf32>
      %239 = arith.mulf %214, %238 : vector<16x128xf32>
      %240 = vector.broadcast %237 : vector<1x128xf32> to vector<16x128xf32>
      %241 = arith.addf %239, %240 : vector<16x128xf32>
      %cst_116 = arith.constant 0.000000e+00 : f32
      %242 = vector.broadcast %cst_116 : f32 to vector<16x128xf32>
      %243 = arith.maximumf %241, %242 : vector<16x128xf32>
      %244 = arith.mulf %243, %45 : vector<16x128xf32>
      %245 = arith.truncf %244 : vector<16x128xf32> to vector<16x128xbf16>
      %c5_117 = arith.constant 5 : index
      %c0_118 = arith.constant 0 : index
      %c0_119 = arith.constant 0 : index
      %246 = vector.load %arg4[%c5_117, %c0_118, %c0_119] : memref<7x128x128xbf16, #tpu.memory_space<vmem>>, vector<1x128x128xbf16>
      %247 = vector.shape_cast %246 : vector<1x128x128xbf16> to vector<128x128xbf16>
      %cst_120 = arith.constant dense<0.000000e+00> : vector<16x128xf32>
      %248 = tpu.matmul %245, %247, %cst_120 {dimension_numbers = #tpu.dot_dimension_numbers<[1], [0], [0], [1], [0, 0, 1, 1], [], []>} : vector<16x128xbf16>, vector<128x128xbf16>, vector<16x128xf32> -> vector<16x128xf32>
      %cst_121 = arith.constant dense<0.000000e+00> : vector<128xf32>
      %249 = vector.multi_reduction <add>, %248, %cst_121 [0] : vector<16x128xf32> to vector<128xf32>
      %250 = vector.shape_cast %249 : vector<128xf32> to vector<1x128xf32>
      %251 = arith.mulf %248, %248 : vector<16x128xf32>
      %cst_122 = arith.constant dense<0.000000e+00> : vector<128xf32>
      %252 = vector.multi_reduction <add>, %251, %cst_122 [0] : vector<16x128xf32> to vector<128xf32>
      %253 = vector.shape_cast %252 : vector<128xf32> to vector<1x128xf32>
      %c64_i32_123 = arith.constant 64 : i32
      %254 = tpu.dynamic_rotate %250 by %c64_i32_123 dim 1 : vector<1x128xf32>, i32 -> vector<1x128xf32>
      %255 = arith.addf %250, %254 : vector<1x128xf32>
      %cst_124 = arith.constant 1.250000e-01 : f32
      %256 = vector.broadcast %cst_124 : f32 to vector<1x128xf32>
      %257 = arith.mulf %255, %256 : vector<1x128xf32>
      %c64_i32_125 = arith.constant 64 : i32
      %258 = tpu.dynamic_rotate %253 by %c64_i32_125 dim 1 : vector<1x128xf32>, i32 -> vector<1x128xf32>
      %259 = arith.addf %253, %258 : vector<1x128xf32>
      %cst_126 = arith.constant 1.250000e-01 : f32
      %260 = vector.broadcast %cst_126 : f32 to vector<1x128xf32>
      %261 = arith.mulf %259, %260 : vector<1x128xf32>
      %262 = arith.mulf %257, %257 : vector<1x128xf32>
      %263 = arith.subf %261, %262 : vector<1x128xf32>
      %cst_127 = arith.constant 9.99999974E-6 : f32
      %264 = vector.broadcast %cst_127 : f32 to vector<1x128xf32>
      %265 = arith.addf %263, %264 : vector<1x128xf32>
      %266 = math.rsqrt %265 : vector<1x128xf32>
      %c6 = arith.constant 6 : index
      %c0_128 = arith.constant 0 : index
      %267 = vector.load %arg5[%c6, %c0_128] : memref<8x128xf32, #tpu.memory_space<vmem>>, vector<1x128xf32>
      %268 = arith.mulf %266, %267 : vector<1x128xf32>
      %c6_129 = arith.constant 6 : index
      %c0_130 = arith.constant 0 : index
      %269 = vector.load %arg6[%c6_129, %c0_130] : memref<8x128xf32, #tpu.memory_space<vmem>>, vector<1x128xf32>
      %270 = arith.mulf %257, %268 : vector<1x128xf32>
      %271 = arith.subf %269, %270 : vector<1x128xf32>
      %272 = vector.broadcast %268 : vector<1x128xf32> to vector<16x128xf32>
      %273 = arith.mulf %248, %272 : vector<16x128xf32>
      %274 = vector.broadcast %271 : vector<1x128xf32> to vector<16x128xf32>
      %275 = arith.addf %273, %274 : vector<16x128xf32>
      %cst_131 = arith.constant 0.000000e+00 : f32
      %276 = vector.broadcast %cst_131 : f32 to vector<16x128xf32>
      %277 = arith.maximumf %275, %276 : vector<16x128xf32>
      %278 = arith.mulf %277, %45 : vector<16x128xf32>
      %279 = arith.truncf %278 : vector<16x128xf32> to vector<16x128xbf16>
      %c6_132 = arith.constant 6 : index
      %c0_133 = arith.constant 0 : index
      %c0_134 = arith.constant 0 : index
      %280 = vector.load %arg4[%c6_132, %c0_133, %c0_134] : memref<7x128x128xbf16, #tpu.memory_space<vmem>>, vector<1x128x128xbf16>
      %281 = vector.shape_cast %280 : vector<1x128x128xbf16> to vector<128x128xbf16>
      %cst_135 = arith.constant dense<0.000000e+00> : vector<16x128xf32>
      %282 = tpu.matmul %279, %281, %cst_135 {dimension_numbers = #tpu.dot_dimension_numbers<[1], [0], [0], [1], [0, 0, 1, 1], [], []>} : vector<16x128xbf16>, vector<128x128xbf16>, vector<16x128xf32> -> vector<16x128xf32>
      %cst_136 = arith.constant dense<0.000000e+00> : vector<128xf32>
      %283 = vector.multi_reduction <add>, %282, %cst_136 [0] : vector<16x128xf32> to vector<128xf32>
      %284 = vector.shape_cast %283 : vector<128xf32> to vector<1x128xf32>
      %285 = arith.mulf %282, %282 : vector<16x128xf32>
      %cst_137 = arith.constant dense<0.000000e+00> : vector<128xf32>
      %286 = vector.multi_reduction <add>, %285, %cst_137 [0] : vector<16x128xf32> to vector<128xf32>
      %287 = vector.shape_cast %286 : vector<128xf32> to vector<1x128xf32>
      %c64_i32_138 = arith.constant 64 : i32
      %288 = tpu.dynamic_rotate %284 by %c64_i32_138 dim 1 : vector<1x128xf32>, i32 -> vector<1x128xf32>
      %289 = arith.addf %284, %288 : vector<1x128xf32>
      %cst_139 = arith.constant 1.250000e-01 : f32
      %290 = vector.broadcast %cst_139 : f32 to vector<1x128xf32>
      %291 = arith.mulf %289, %290 : vector<1x128xf32>
      %c64_i32_140 = arith.constant 64 : i32
      %292 = tpu.dynamic_rotate %287 by %c64_i32_140 dim 1 : vector<1x128xf32>, i32 -> vector<1x128xf32>
      %293 = arith.addf %287, %292 : vector<1x128xf32>
      %cst_141 = arith.constant 1.250000e-01 : f32
      %294 = vector.broadcast %cst_141 : f32 to vector<1x128xf32>
      %295 = arith.mulf %293, %294 : vector<1x128xf32>
      %296 = arith.mulf %291, %291 : vector<1x128xf32>
      %297 = arith.subf %295, %296 : vector<1x128xf32>
      %cst_142 = arith.constant 9.99999974E-6 : f32
      %298 = vector.broadcast %cst_142 : f32 to vector<1x128xf32>
      %299 = arith.addf %297, %298 : vector<1x128xf32>
      %300 = math.rsqrt %299 : vector<1x128xf32>
      %c7 = arith.constant 7 : index
      %c0_143 = arith.constant 0 : index
      %301 = vector.load %arg5[%c7, %c0_143] : memref<8x128xf32, #tpu.memory_space<vmem>>, vector<1x128xf32>
      %302 = arith.mulf %300, %301 : vector<1x128xf32>
      %c7_144 = arith.constant 7 : index
      %c0_145 = arith.constant 0 : index
      %303 = vector.load %arg6[%c7_144, %c0_145] : memref<8x128xf32, #tpu.memory_space<vmem>>, vector<1x128xf32>
      %304 = arith.mulf %291, %302 : vector<1x128xf32>
      %305 = arith.subf %303, %304 : vector<1x128xf32>
      %306 = vector.broadcast %302 : vector<1x128xf32> to vector<16x128xf32>
      %307 = arith.mulf %282, %306 : vector<16x128xf32>
      %308 = vector.broadcast %305 : vector<1x128xf32> to vector<16x128xf32>
      %309 = arith.addf %307, %308 : vector<16x128xf32>
      %cst_146 = arith.constant 0.000000e+00 : f32
      %310 = vector.broadcast %cst_146 : f32 to vector<16x128xf32>
      %311 = arith.maximumf %309, %310 : vector<16x128xf32>
      %312 = arith.mulf %311, %45 : vector<16x128xf32>
      %313 = arith.truncf %312 : vector<16x128xf32> to vector<16x128xbf16>
      %c0_147 = arith.constant 0 : index
      %c0_148 = arith.constant 0 : index
      %314 = vector.load %arg7[%c0_147, %c0_148] : memref<128x2xbf16, #tpu.memory_space<vmem>>, vector<128x2xbf16>
      %cst_149 = arith.constant dense<0.000000e+00> : vector<16x2xf32>
      %315 = tpu.matmul %313, %314, %cst_149 {dimension_numbers = #tpu.dot_dimension_numbers<[1], [0], [0], [1], [0, 0, 1, 1], [], []>} : vector<16x128xbf16>, vector<128x2xbf16>, vector<16x2xf32> -> vector<16x2xf32>
      %c0_150 = arith.constant 0 : index
      %c0_151 = arith.constant 0 : index
      %316 = vector.load %arg8[%c0_150, %c0_151] : memref<1x2xf32, #tpu.memory_space<vmem>>, vector<1x2xf32>
      %317 = vector.broadcast %316 : vector<1x2xf32> to vector<16x2xf32>
      %318 = arith.addf %315, %317 : vector<16x2xf32>
      %c0_152 = arith.constant 0 : index
      %c0_153 = arith.constant 0 : index
      %319 = vector.load %arg9[%c0_152, %c0_153] : memref<16x2xf32, #tpu.memory_space<vmem>>, vector<16x2xf32>
      tpu.vector_store %arg9[%c0_152, %c0_153], %318 {strides = array<i32>} : memref<16x2xf32, #tpu.memory_space<vmem>>, vector<16x2xf32>,
    } else {
    }
    return
  }
  func.func @transform_0(%arg0: i32) -> (i32, i32) {
    %c0_i32 = arith.constant 0 : i32
    %c0_i32_0 = arith.constant 0 : i32
    return %arg0, %c0_i32 : i32, i32
  }
  func.func @transform_1(%arg0: i32) -> (i32, i32) {
    %c1_i32 = arith.constant 1 : i32
    %0 = arith.addi %arg0, %c1_i32 : i32
    %c0_i32 = arith.constant 0 : i32
    %c0_i32_0 = arith.constant 0 : i32
    return %0, %c0_i32 : i32, i32
  }
  func.func @transform_2(%arg0: i32) -> (i32, i32, i32) {
    %c0_i32 = arith.constant 0 : i32
    %c0_i32_0 = arith.constant 0 : i32
    %c0_i32_1 = arith.constant 0 : i32
    %c0_i32_2 = arith.constant 0 : i32
    return %c0_i32, %c0_i32_0, %c0_i32_1 : i32, i32, i32
  }
  func.func @transform_3(%arg0: i32) -> (i32, i32, i32) {
    %c0_i32 = arith.constant 0 : i32
    %c0_i32_0 = arith.constant 0 : i32
    %c0_i32_1 = arith.constant 0 : i32
    %c0_i32_2 = arith.constant 0 : i32
    return %c0_i32, %c0_i32_0, %c0_i32_1 : i32, i32, i32
  }
  func.func @transform_4(%arg0: i32) -> (i32, i32) {
    %c0_i32 = arith.constant 0 : i32
    %c0_i32_0 = arith.constant 0 : i32
    %c0_i32_1 = arith.constant 0 : i32
    return %c0_i32, %c0_i32_0 : i32, i32
  }
  func.func @transform_5(%arg0: i32) -> (i32, i32) {
    %c0_i32 = arith.constant 0 : i32
    %c0_i32_0 = arith.constant 0 : i32
    %c0_i32_1 = arith.constant 0 : i32
    return %c0_i32, %c0_i32_0 : i32, i32
  }
  func.func @transform_6(%arg0: i32) -> (i32, i32) {
    %c0_i32 = arith.constant 0 : i32
    %c0_i32_0 = arith.constant 0 : i32
    %c0_i32_1 = arith.constant 0 : i32
    return %c0_i32, %c0_i32_0 : i32, i32
  }
  func.func @transform_7(%arg0: i32) -> (i32, i32) {
    %c0_i32 = arith.constant 0 : i32
    %c0_i32_0 = arith.constant 0 : i32
    %c0_i32_1 = arith.constant 0 : i32
    return %c0_i32, %c0_i32_0 : i32, i32
  }
  func.func @transform_8(%arg0: i32) -> (i32, i32) {
    %c0_i32 = arith.constant 0 : i32
    %c0_i32_0 = arith.constant 0 : i32
    %c0_i32_1 = arith.constant 0 : i32
    return %c0_i32, %c0_i32_0 : i32, i32
  }
}

</mosaic_0001>

<bundles_post_ra>
// kernel: tpu_custom_call.1
= control target key start
LH: loop header
LB: loop body
LE: loop exit
PB: predicated region body
PF: predicated region fallthrough
CT: control target
= control target key end

     0   :  { %13 = vsyncpa [#allocation6], 0  ;;  %s3800_s0 = inlined_call_operand.hbm [shape: f32[32,1024], index: 0, kind: input, shape index: {}]   ;;  %s3801_s1 = inlined_call_operand.hbm [shape: f32[32,1024], index: 1, kind: input, shape index: {}]   ;;  %s3802_s2 = inlined_call_operand.hbm [shape: bf16[2,1024,128], index: 2, kind: input, shape index: {}]   ;;  %s3803_s3 = inlined_call_operand.hbm [shape: bf16[7,128,128], index: 3, kind: input, shape index: {}]   ;;  %s3804_s4 = inlined_call_operand.vmem [shape: f32[8,128], index: 4, kind: input, shape index: {}]   ;;  %s3805_s5 = inlined_call_operand.vmem [shape: f32[8,128], index: 5, kind: input, shape index: {}]   ;;  %s3806_s6 = inlined_call_operand.vmem [shape: bf16[128,2], index: 6, kind: input, shape index: {}]   ;;  %s3807_s7 = inlined_call_operand.vmem [shape: f32[1,2], index: 7, kind: input, shape index: {}]   ;;  %s3808_s8 = inlined_call_operand.vmem [shape: f32[16,2], index: 8, kind: output, shape index: {}]  }
   0x1   :  { %14 = vsyncpa [#allocation8], 0 }
   0x2   :  { %15 = vsyncpa [#allocation11], 0  ;;  %s2513_s29 = scalar_lea.hbm %s3801_s1, 128  ;;  %s3614_s9 = smov [#allocation7]  }
   0x3   :  { %s38_s30 = sshll.u32 %s2513_s29, 4  ;;  %s40_s10 = sshll.u32 %s3614_s9, 4  ;;  %s39_s30 = int_to_ptr.hbm [resolvable:$true] %s38_s30  ;;  %s41_s10 = int_to_ptr.vmem [resolvable:$true] %s40_s10 }
   0x4   :  { %s3615_s11 = smov 1024   ;;  %s3616_s12 = smov 64  }
   0x5   :  { %46 = dma.hbm_to_vmem [thread:$0]  %s39_s30, 2048, %s41_s10, [#allocation8], %s3615_s11, %s3615_s11, %s3616_s12  }
   0x6   :  { %s20_s15 = sshll.u32 %s3800_s0, 4  ;;  %s3617_s16 = smov [#allocation5]   ;;  %s21_s15 = int_to_ptr.hbm [resolvable:$true] %s20_s15 }
   0x7   :  { %s22_s17 = sshll.u32 %s3617_s16, 4  ;;  %s51_s1 = sshll.u32 %s3802_s2, 4  ;;  %s23_s17 = int_to_ptr.vmem [resolvable:$true] %s22_s17  ;;  %s52_s1 = int_to_ptr.hbm [resolvable:$true] %s51_s1 }
   0x8   :  { %28 = dma.hbm_to_vmem [thread:$0]  %s21_s15, 2048, %s23_s17, [#allocation6], %s3615_s11, %s3615_s11, %s3616_s12  }
   0x9   :  { %s3618_s20 = smov [#allocation9]   ;;  %s64_s24 = sshll.u32 %s3803_s3, 4  ;;  %s65_s24 = int_to_ptr.hbm [resolvable:$true] %s64_s24 }
   0xa   :  { %s53_s21 = sshll.u32 %s3618_s20, 4  ;;  %s3619_s25 = smov 4   ;;  %s54_s21 = int_to_ptr.vmem [resolvable:$true] %s53_s21 }
   0xb   :  { %59 = dma.hbm_to_vmem [thread:$0]  %s52_s1, 16384, %s54_s21, [#allocation8], %s3616_s12, %s3616_s12, %s3619_s25  }
   0xc   :  { %s3620_s0 = smov [#allocation10]  }
   0xd   :  { %s66_s26 = sshll.u32 %s3620_s0, 4  ;;  %s67_s26 = int_to_ptr.vmem [resolvable:$true] %s66_s26 }
   0xe   :  { %72 = dma.hbm_to_vmem [thread:$0]  %s65_s24, 7168, %s67_s26, [#allocation11], %s3616_s12, %s3616_s12, %s3619_s25  }
   0xf   :  { %3608 = dma.done.wait [#allocation6], 2048  }
  0x10   :  { %3609 = vsyncadd [#allocation6], 4294965248 }
  0x11   :  { %3610 = dma.done.wait [#allocation8], 18432  }
  0x12   :  { %3611 = vsyncadd [#allocation8], 4294948864 }
  0x13   :  { %3612 = dma.done.wait [#allocation11], 7168  }
  0x14   :  { %3613 = vsyncadd [#allocation11], 4294960128  ;;  %v3356_v0 = vld [vmem:[#allocation9 + $0x238] sm:$0xff]  ;;  %v3355_v4 = vld [vmem:[#allocation9 + $0x230] sm:$0xff] }
  0x15   :  { %v3364_v1 = vld [vmem:[#allocation9 + $0x278] sm:$0xff]  ;;  %794 = vmatpush.bf16.msra.mxu0 %v3356_v0  ;;  %v3363_v5 = vld [vmem:[#allocation9 + $0x270] sm:$0xff]  ;;  %v3354_v8 = vld [vmem:[#allocation9 + $0x228] sm:$0xff] }
  0x16   :  { %v3372_v2 = vld [vmem:[#allocation9 + $0x2b8] sm:$0xff]  ;;  %808 = vmatpush.bf16.msra.mxu1 %v3364_v1  ;;  %v3371_v6 = vld [vmem:[#allocation9 + $0x2b0] sm:$0xff]  ;;  %v3362_v9 = vld [vmem:[#allocation9 + $0x268] sm:$0xff] }
  0x17   :  { %v3380_v3 = vld [vmem:[#allocation9 + $0x2f8] sm:$0xff]  ;;  %822 = vmatpush.bf16.msra.mxu2 %v3372_v2  ;;  %v3379_v7 = vld [vmem:[#allocation9 + $0x2f0] sm:$0xff]  ;;  %v3370_v10 = vld [vmem:[#allocation9 + $0x2a8] sm:$0xff] }
  0x18   :  { %836 = vmatpush.bf16.msra.mxu3 %v3380_v3  ;;  %v3378_v11 = vld [vmem:[#allocation9 + $0x2e8] sm:$0xff]  ;;  %v3353_v12 = vld [vmem:[#allocation9 + $0x220] sm:$0xff]  ;;  %v3352_v16 = vld [vmem:[#allocation9 + $0x218] sm:$0xff] }
  0x19   :  { %795 = vmatpush.bf16.msra.mxu0 %v3355_v4  ;;  %v3361_v13 = vld [vmem:[#allocation9 + $0x260] sm:$0xff]  ;;  %v3360_v17 = vld [vmem:[#allocation9 + $0x258] sm:$0xff]  ;;  %v3351_v20 = vld [vmem:[#allocation9 + $0x210] sm:$0xff] }
  0x1a   :  { %809 = vmatpush.bf16.msra.mxu1 %v3363_v5  ;;  %v3369_v14 = vld [vmem:[#allocation9 + $0x2a0] sm:$0xff]  ;;  %v3368_v18 = vld [vmem:[#allocation9 + $0x298] sm:$0xff]  ;;  %v3359_v21 = vld [vmem:[#allocation9 + $0x250] sm:$0xff] }
  0x1b   :  { %823 = vmatpush.bf16.msra.mxu2 %v3371_v6  ;;  %v3377_v15 = vld [vmem:[#allocation9 + $0x2e0] sm:$0xff]  ;;  %v3376_v19 = vld [vmem:[#allocation9 + $0x2d8] sm:$0xff]  ;;  %v3367_v22 = vld [vmem:[#allocation9 + $0x290] sm:$0xff] }
  0x1c   :  { %837 = vmatpush.bf16.msra.mxu3 %v3379_v7  ;;  %v3375_v23 = vld [vmem:[#allocation9 + $0x2d0] sm:$0xff]  ;;  %v3350_v24 = vld [vmem:[#allocation9 + $0x208] sm:$0xff]  ;;  %v3349_v28 = vld [vmem:[#allocation9 + $0x200] sm:$0xff] }
  0x1d   :  { %796 = vmatpush.bf16.msra.mxu0 %v3354_v8  ;;  %v3358_v25 = vld [vmem:[#allocation9 + $0x248] sm:$0xff]  ;;  %v3357_v29 = vld [vmem:[#allocation9 + $0x240] sm:$0xff]  ;;  %v3388_v32 = vld [vmem:[#allocation9 + $0x338] sm:$0xff] }
  0x1e   :  { %810 = vmatpush.bf16.msra.mxu1 %v3362_v9  ;;  %v3366_v26 = vld [vmem:[#allocation9 + $0x288] sm:$0xff]  ;;  %v3365_v30 = vld [vmem:[#allocation9 + $0x280] sm:$0xff]  ;;  %v3396_v33 = vld [vmem:[#allocation9 + $0x378] sm:$0xff] }
  0x1f   :  { %824 = vmatpush.bf16.msra.mxu2 %v3370_v10  ;;  %v3374_v27 = vld [vmem:[#allocation9 + $0x2c8] sm:$0xff]  ;;  %v3373_v31 = vld [vmem:[#allocation9 + $0x2c0] sm:$0xff]  ;;  %v259_v36 = vld [vmem:[#allocation7 + $0x10] sm:$0xff] }
  0x20   :  { %838 = vmatpush.bf16.msra.mxu3 %v3378_v11  ;;  %v257_v34 = vld [vmem:[#allocation7] sm:$0xff]  ;;  %v267_v37 = vld [vmem:[#allocation7 + $0x50] sm:$0xff]  ;;  %v258_v38 = vld [vmem:[#allocation7 + $0x8] sm:$0xff] }
  0x21   :  { %797 = vmatpush.bf16.msra.mxu0 %v3353_v12  ;;  %v265_v35 = vld [vmem:[#allocation7 + $0x40] sm:$0xff]  ;;  %v266_v39 = vld [vmem:[#allocation7 + $0x48] sm:$0xff]  ;;  %v260_v40 = vld [vmem:[#allocation7 + $0x18] sm:$0xff]  ;;  %v275_v45 = vpack.c.bf16 %v267_v37, %v259_v36 }
  0x22   :  { %811 = vmatpush.bf16.msra.mxu1 %v3361_v13  ;;  %v268_v41 = vld [vmem:[#allocation7 + $0x58] sm:$0xff]  ;;  %v273_v44 = vpack.c.bf16 %v265_v35, %v257_v34  ;;  %v274_v46 = vpack.c.bf16 %v266_v39, %v258_v38  ;;  %v3387_v48 = vld [vmem:[#allocation9 + $0x330] sm:$0xff]  ;;  %v3386_v52 = vld [vmem:[#allocation9 + $0x328] sm:$0xff] }
  0x23   :  { %825 = vmatpush.bf16.msra.mxu2 %v3369_v14  ;;  %v3404_v42 = vld [vmem:[#allocation9 + $0x3b8] sm:$0xff]  ;;  %v276_v47 = vpack.c.bf16 %v268_v41, %v260_v40  ;;  %v3395_v49 = vld [vmem:[#allocation9 + $0x370] sm:$0xff]  ;;  %v3394_v53 = vld [vmem:[#allocation9 + $0x368] sm:$0xff] }
  0x24   :  { %839 = vmatpush.bf16.msra.mxu3 %v3377_v15  ;;  %v3412_v43 = vld [vmem:[#allocation9 + $0x3f8] sm:$0xff]  ;;  %v3403_v50 = vld [vmem:[#allocation9 + $0x3b0] sm:$0xff]  ;;  %v3402_v54 = vld [vmem:[#allocation9 + $0x3a8] sm:$0xff] }
  0x25   :  { %798 = vmatpush.bf16.msra.mxu0 %v3352_v16  ;;  %v3411_v51 = vld [vmem:[#allocation9 + $0x3f0] sm:$0xff]  ;;  %v3410_v55 = vld [vmem:[#allocation9 + $0x3e8] sm:$0xff]  ;;  %v3385_v56 = vld [vmem:[#allocation9 + $0x320] sm:$0xff] }
  0x26   :  { %812 = vmatpush.bf16.msra.mxu1 %v3360_v17  ;;  %v3393_v57 = vld [vmem:[#allocation9 + $0x360] sm:$0xff]  ;;  %v3384_v60 = vld [vmem:[#allocation9 + $0x318] sm:$0xff]  ;;  %v3383_v0 = vld [vmem:[#allocation9 + $0x310] sm:$0xff] }
  0x27   :  { %826 = vmatpush.bf16.msra.mxu2 %v3368_v18  ;;  %v3401_v58 = vld [vmem:[#allocation9 + $0x3a0] sm:$0xff]  ;;  %v3392_v61 = vld [vmem:[#allocation9 + $0x358] sm:$0xff]  ;;  %v3391_v1 = vld [vmem:[#allocation9 + $0x350] sm:$0xff] }
  0x28   :  { %840 = vmatpush.bf16.msra.mxu3 %v3376_v19  ;;  %v3409_v59 = vld [vmem:[#allocation9 + $0x3e0] sm:$0xff]  ;;  %v3400_v62 = vld [vmem:[#allocation9 + $0x398] sm:$0xff]  ;;  %v3399_v2 = vld [vmem:[#allocation9 + $0x390] sm:$0xff] }
  0x29   :  { %799 = vmatpush.bf16.msra.mxu0 %v3351_v20  ;;  %v3408_v63 = vld [vmem:[#allocation9 + $0x3d8] sm:$0xff]  ;;  %v3407_v3 = vld [vmem:[#allocation9 + $0x3d0] sm:$0xff]  ;;  %v3382_v4 = vld [vmem:[#allocation9 + $0x308] sm:$0xff] }
  0x2a   :  { %813 = vmatpush.bf16.msra.mxu1 %v3359_v21  ;;  %v3390_v5 = vld [vmem:[#allocation9 + $0x348] sm:$0xff]  ;;  %v3381_v8 = vld [vmem:[#allocation9 + $0x300] sm:$0xff]  ;;  %v3292_v12 = vld [vmem:[#allocation9 + $0x38] sm:$0xff] }
  0x2b   :  { %827 = vmatpush.bf16.msra.mxu2 %v3367_v22  ;;  %v3398_v6 = vld [vmem:[#allocation9 + $0x388] sm:$0xff]  ;;  %v3389_v9 = vld [vmem:[#allocation9 + $0x340] sm:$0xff]  ;;  %v3300_v13 = vld [vmem:[#allocation9 + $0x78] sm:$0xff] }
  0x2c   :  { %841 = vmatpush.bf16.msra.mxu3 %v3375_v23  ;;  %v3406_v7 = vld [vmem:[#allocation9 + $0x3c8] sm:$0xff]  ;;  %v3397_v10 = vld [vmem:[#allocation9 + $0x380] sm:$0xff]  ;;  %v263_v16 = vld [vmem:[#allocation7 + $0x30] sm:$0xff] }
  0x2d   :  { %800 = vmatpush.bf16.msra.mxu0 %v3350_v24  ;;  %v3405_v11 = vld [vmem:[#allocation9 + $0x3c0] sm:$0xff]  ;;  %v271_v17 = vld [vmem:[#allocation7 + $0x70] sm:$0xff]  ;;  %v262_v18 = vld [vmem:[#allocation7 + $0x28] sm:$0xff] }
  0x2e   :  { %814 = vmatpush.bf16.msra.mxu1 %v3358_v25  ;;  %v261_v14 = vld [vmem:[#allocation7 + $0x20] sm:$0xff]  ;;  %v270_v19 = vld [vmem:[#allocation7 + $0x68] sm:$0xff]  ;;  %v264_v20 = vld [vmem:[#allocation7 + $0x38] sm:$0xff]  ;;  %v279_v25 = vpack.c.bf16 %v271_v17, %v263_v16 }
  0x2f   :  { %828 = vmatpush.bf16.msra.mxu2 %v3366_v26  ;;  %v269_v15 = vld [vmem:[#allocation7 + $0x60] sm:$0xff]  ;;  %v272_v21 = vld [vmem:[#allocation7 + $0x78] sm:$0xff]  ;;  %v278_v26 = vpack.c.bf16 %v270_v19, %v262_v18  ;;  %v3306_v34 = vld [vmem:[#allocation9 + $0xa8] sm:$0xff] }
  0x30   :  { %842 = vmatpush.bf16.msra.mxu3 %v3374_v27  ;;  %v3308_v22 = vld [vmem:[#allocation9 + $0xb8] sm:$0xff]  ;;  %v277_v24 = vpack.c.bf16 %v269_v15, %v261_v14  ;;  %v280_v27 = vpack.c.bf16 %v272_v21, %v264_v20  ;;  %v3314_v35 = vld [vmem:[#allocation9 + $0xe8] sm:$0xff]  ;;  %v3289_v36 = vld [vmem:[#allocation9 + $0x20] sm:$0xff] }
  0x31   :  { %801 = vmatpush.bf16.msra.mxu0 %v3349_v28  ;;  %v3316_v23 = vld [vmem:[#allocation9 + $0xf8] sm:$0xff]  ;;  %v3291_v28 = vld [vmem:[#allocation9 + $0x30] sm:$0xff]  ;;  %v3297_v37 = vld [vmem:[#allocation9 + $0x60] sm:$0xff] }
  0x32   :  { %815 = vmatpush.bf16.msra.mxu1 %v3357_v29  ;;  %v3299_v29 = vld [vmem:[#allocation9 + $0x70] sm:$0xff]  ;;  %v3305_v38 = vld [vmem:[#allocation9 + $0xa0] sm:$0xff]  ;;  %v3288_v40 = vld [vmem:[#allocation9 + $0x18] sm:$0xff] }
  0x33   :  { %829 = vmatpush.bf16.msra.mxu2 %v3365_v30  ;;  %v3307_v30 = vld [vmem:[#allocation9 + $0xb0] sm:$0xff]  ;;  %v3313_v39 = vld [vmem:[#allocation9 + $0xe0] sm:$0xff]  ;;  %v3296_v41 = vld [vmem:[#allocation9 + $0x58] sm:$0xff] }
  0x34   :  { %843 = vmatpush.bf16.msra.mxu3 %v3373_v31  ;;  %802 = vmatmul.bf16.vlgmr.msra.gmra.mxu0 %v273_v44  ;;  %v3315_v31 = vld [vmem:[#allocation9 + $0xf0] sm:$0xff]  ;;  %v3338_v14 = vld [vmem:[#allocation9 + $0x1a8] sm:$0xff]  ;;  %v3321_v16 = vld [vmem:[#allocation9 + $0x120] sm:$0xff] }
  0x35   :  { %850 = vmatpush.bf16.msrb.mxu0 %v3388_v32  ;;  %816 = vmatmul.bf16.vlgmr.msra.gmra.mxu1 %v274_v46  ;;  %v3290_v32 = vld [vmem:[#allocation9 + $0x28] sm:$0xff]  ;;  %v3287_v44 = vld [vmem:[#allocation9 + $0x10] sm:$0xff]  ;;  %v3329_v17 = vld [vmem:[#allocation9 + $0x160] sm:$0xff] }
  0x36   :  { %864 = vmatpush.bf16.msrb.mxu1 %v3396_v33  ;;  %830 = vmatmul.bf16.vlgmr.msra.gmra.mxu2 %v275_v45  ;;  %v3298_v33 = vld [vmem:[#allocation9 + $0x68] sm:$0xff]  ;;  %v3295_v45 = vld [vmem:[#allocation9 + $0x50] sm:$0xff]  ;;  %v3337_v18 = vld [vmem:[#allocation9 + $0x1a0] sm:$0xff] }
  0x37   :  { %878 = vmatpush.bf16.msrb.mxu2 %v3404_v42  ;;  %844 = vmatmul.bf16.vlgmr.msra.gmra.mxu3 %v276_v47  ;;  %v3304_v42 = vld [vmem:[#allocation9 + $0x98] sm:$0xff]  ;;  %v3303_v46 = vld [vmem:[#allocation9 + $0x90] sm:$0xff]  ;;  %v3346_v15 = vld [vmem:[#allocation9 + $0x1e8] sm:$0xff] }
  0x38   :  { %892 = vmatpush.bf16.msrb.mxu3 %v3412_v43  ;;  %v3312_v43 = vld [vmem:[#allocation9 + $0xd8] sm:$0xff]  ;;  %v3311_v47 = vld [vmem:[#allocation9 + $0xd0] sm:$0xff]  ;;  %v3345_v19 = vld [vmem:[#allocation9 + $0x1e0] sm:$0xff] }
  0x39   :  { %851 = vmatpush.bf16.msrb.mxu0 %v3387_v48  ;;  %v3286_v48 = vld [vmem:[#allocation9 + $0x8] sm:$0xff]  ;;  %v3320_v20 = vld [vmem:[#allocation9 + $0x118] sm:$0xff] }
  0x3a   :  { %865 = vmatpush.bf16.msrb.mxu1 %v3395_v49  ;;  %v3294_v49 = vld [vmem:[#allocation9 + $0x48] sm:$0xff]  ;;  %v3328_v21 = vld [vmem:[#allocation9 + $0x158] sm:$0xff] }
  0x3b   :  { %879 = vmatpush.bf16.msrb.mxu2 %v3403_v50  ;;  %v3302_v50 = vld [vmem:[#allocation9 + $0x88] sm:$0xff] }
  0x3c   :  { %893 = vmatpush.bf16.msrb.mxu3 %v3411_v51  ;;  %v3310_v51 = vld [vmem:[#allocation9 + $0xc8] sm:$0xff] }
  0x3d   :  { %852 = vmatpush.bf16.msrb.mxu0 %v3386_v52  ;;  %v3285_v52 = vld [vmem:[#allocation9] sm:$0xff] }
  0x3e   :  { %866 = vmatpush.bf16.msrb.mxu1 %v3394_v53  ;;  %v3293_v53 = vld [vmem:[#allocation9 + $0x40] sm:$0xff] }
  0x3f   :  { %880 = vmatpush.bf16.msrb.mxu2 %v3402_v54  ;;  %v3301_v54 = vld [vmem:[#allocation9 + $0x80] sm:$0xff] }
  0x40   :  { %894 = vmatpush.bf16.msrb.mxu3 %v3410_v55  ;;  %v3309_v55 = vld [vmem:[#allocation9 + $0xc0] sm:$0xff] }
  0x41   :  { %853 = vmatpush.bf16.msrb.mxu0 %v3385_v56  ;;  %v3324_v56 = vld [vmem:[#allocation9 + $0x138] sm:$0xff] }
  0x42   :  { %867 = vmatpush.bf16.msrb.mxu1 %v3393_v57  ;;  %v3332_v57 = vld [vmem:[#allocation9 + $0x178] sm:$0xff] }
  0x43   :  { %881 = vmatpush.bf16.msrb.mxu2 %v3401_v58  ;;  %v105_v58 = vld [vmem:[#allocation5] sm:$0xff] }
  0x44   :  { %895 = vmatpush.bf16.msrb.mxu3 %v3409_v59  ;;  %v113_v59 = vld [vmem:[#allocation5 + $0x40] sm:$0xff] }
  0x45   :  { %854 = vmatpush.bf16.msrb.mxu0 %v3384_v60  ;;  %v107_v60 = vld [vmem:[#allocation5 + $0x10] sm:$0xff] }
  0x46   :  { %868 = vmatpush.bf16.msrb.mxu1 %v3392_v61  ;;  %v115_v61 = vld [vmem:[#allocation5 + $0x50] sm:$0xff] }
  0x47   :  { %882 = vmatpush.bf16.msrb.mxu2 %v3400_v62  ;;  %v106_v62 = vld [vmem:[#allocation5 + $0x8] sm:$0xff] }
  0x48   :  { %896 = vmatpush.bf16.msrb.mxu3 %v3408_v63  ;;  %v114_v63 = vld [vmem:[#allocation5 + $0x48] sm:$0xff] }
  0x49   :  { %855 = vmatpush.bf16.msrb.mxu0 %v3383_v0  ;;  %v108_v0 = vld [vmem:[#allocation5 + $0x18] sm:$0xff] }
  0x4a   :  { %869 = vmatpush.bf16.msrb.mxu1 %v3391_v1  ;;  %v116_v1 = vld [vmem:[#allocation5 + $0x58] sm:$0xff] }
  0x4b   :  { %883 = vmatpush.bf16.msrb.mxu2 %v3399_v2  ;;  %v3340_v2 = vld [vmem:[#allocation9 + $0x1b8] sm:$0xff] }
  0x4c   :  { %897 = vmatpush.bf16.msrb.mxu3 %v3407_v3  ;;  %v3348_v3 = vld [vmem:[#allocation9 + $0x1f8] sm:$0xff] }
  0x4d   :  { %856 = vmatpush.bf16.msrb.mxu0 %v3382_v4  ;;  %v121_v4 = vpack.c.bf16 %v113_v59, %v105_v58 }
  0x4e   :  { %870 = vmatpush.bf16.msrb.mxu1 %v3390_v5  ;;  %v123_v5 = vpack.c.bf16 %v115_v61, %v107_v60 }
  0x4f   :  { %884 = vmatpush.bf16.msrb.mxu2 %v3398_v6  ;;  %v122_v6 = vpack.c.bf16 %v114_v63, %v106_v62 }
  0x50   :  { %898 = vmatpush.bf16.msrb.mxu3 %v3406_v7  ;;  %v124_v7 = vpack.c.bf16 %v116_v1, %v108_v0 }
  0x51   :  { %857 = vmatpush.bf16.msrb.mxu0 %v3381_v8  ;;  %v3323_v8 = vld [vmem:[#allocation9 + $0x130] sm:$0xff] }
  0x52   :  { %871 = vmatpush.bf16.msrb.mxu1 %v3389_v9  ;;  %v3331_v9 = vld [vmem:[#allocation9 + $0x170] sm:$0xff] }
  0x53   :  { %885 = vmatpush.bf16.msrb.mxu2 %v3397_v10  ;;  %v3339_v10 = vld [vmem:[#allocation9 + $0x1b0] sm:$0xff] }
  0x54   :  { %899 = vmatpush.bf16.msrb.mxu3 %v3405_v11  ;;  %858 = vmatmul.bf16.vlgmr.msrb.gmra.mxu0 %v277_v24  ;;  %v3347_v11 = vld [vmem:[#allocation9 + $0x1f0] sm:$0xff] }
  0x55   :  { %1290 = vmatpush.bf16.msra.mxu0 %v3292_v12  ;;  %872 = vmatmul.bf16.vlgmr.msrb.gmra.mxu1 %v278_v26  ;;  %v3322_v12 = vld [vmem:[#allocation9 + $0x128] sm:$0xff]  ;;  %v3319_v24 = vld [vmem:[#allocation9 + $0x110] sm:$0xff] }
  0x56   :  { %1304 = vmatpush.bf16.msra.mxu1 %v3300_v13  ;;  %886 = vmatmul.bf16.vlgmr.msrb.gmra.mxu2 %v279_v25  ;;  %v3330_v13 = vld [vmem:[#allocation9 + $0x168] sm:$0xff]  ;;  %v3327_v25 = vld [vmem:[#allocation9 + $0x150] sm:$0xff] }
  0x57   :  { %1318 = vmatpush.bf16.msra.mxu2 %v3308_v22  ;;  %900 = vmatmul.bf16.vlgmr.msrb.gmra.mxu3 %v280_v27  ;;  %v3336_v22 = vld [vmem:[#allocation9 + $0x198] sm:$0xff]  ;;  %v3335_v26 = vld [vmem:[#allocation9 + $0x190] sm:$0xff] }
  0x58   :  { %1332 = vmatpush.bf16.msra.mxu3 %v3316_v23  ;;  %v3344_v23 = vld [vmem:[#allocation9 + $0x1d8] sm:$0xff]  ;;  %v3343_v27 = vld [vmem:[#allocation9 + $0x1d0] sm:$0xff] }
  0x59   :  { %1291 = vmatpush.bf16.msra.mxu0 %v3291_v28  ;;  %v3318_v28 = vld [vmem:[#allocation9 + $0x108] sm:$0xff] }
  0x5a   :  { %1305 = vmatpush.bf16.msra.mxu1 %v3299_v29  ;;  %v3326_v29 = vld [vmem:[#allocation9 + $0x148] sm:$0xff] }
  0x5b   :  { %1319 = vmatpush.bf16.msra.mxu2 %v3307_v30  ;;  %v3334_v30 = vld [vmem:[#allocation9 + $0x188] sm:$0xff] }
  0x5c   :  { %1333 = vmatpush.bf16.msra.mxu3 %v3315_v31  ;;  %v3342_v31 = vld [vmem:[#allocation9 + $0x1c8] sm:$0xff] }
  0x5d   :  { %1292 = vmatpush.bf16.msra.mxu0 %v3290_v32  ;;  %v3317_v32 = vld [vmem:[#allocation9 + $0x100] sm:$0xff] }
  0x5e   :  { %1306 = vmatpush.bf16.msra.mxu1 %v3298_v33  ;;  %v3325_v33 = vld [vmem:[#allocation9 + $0x140] sm:$0xff] }
  0x5f   :  { %1320 = vmatpush.bf16.msra.mxu2 %v3306_v34  ;;  %v3333_v34 = vld [vmem:[#allocation9 + $0x180] sm:$0xff] }
  0x60   :  { %1334 = vmatpush.bf16.msra.mxu3 %v3314_v35  ;;  %v3341_v35 = vld [vmem:[#allocation9 + $0x1c0] sm:$0xff] }
  0x61   :  { %1293 = vmatpush.bf16.msra.mxu0 %v3289_v36  ;;  %v109_v36 = vld [vmem:[#allocation5 + $0x20] sm:$0xff] }
  0x62   :  { %1307 = vmatpush.bf16.msra.mxu1 %v3297_v37  ;;  %v117_v37 = vld [vmem:[#allocation5 + $0x60] sm:$0xff] }
  0x63   :  { %1321 = vmatpush.bf16.msra.mxu2 %v3305_v38  ;;  %v110_v38 = vld [vmem:[#allocation5 + $0x28] sm:$0xff] }
  0x64   :  { %1335 = vmatpush.bf16.msra.mxu3 %v3313_v39  ;;  %v118_v39 = vld [vmem:[#allocation5 + $0x68] sm:$0xff] }
  0x65   :  { %1294 = vmatpush.bf16.msra.mxu0 %v3288_v40  ;;  %v111_v40 = vld [vmem:[#allocation5 + $0x30] sm:$0xff] }
  0x66   :  { %1308 = vmatpush.bf16.msra.mxu1 %v3296_v41  ;;  %v119_v41 = vld [vmem:[#allocation5 + $0x70] sm:$0xff] }
  0x67   :  { %1322 = vmatpush.bf16.msra.mxu2 %v3304_v42  ;;  %v112_v42 = vld [vmem:[#allocation5 + $0x38] sm:$0xff] }
  0x68   :  { %1336 = vmatpush.bf16.msra.mxu3 %v3312_v43  ;;  %v120_v43 = vld [vmem:[#allocation5 + $0x78] sm:$0xff] }
  0x69   :  { %1295 = vmatpush.bf16.msra.mxu0 %v3287_v44  ;;  %v125_v44 = vpack.c.bf16 %v117_v37, %v109_v36 }
  0x6a   :  { %1309 = vmatpush.bf16.msra.mxu1 %v3295_v45  ;;  %v126_v45 = vpack.c.bf16 %v118_v39, %v110_v38 }
  0x6b   :  { %1323 = vmatpush.bf16.msra.mxu2 %v3303_v46  ;;  %v127_v46 = vpack.c.bf16 %v119_v41, %v111_v40 }
  0x6c   :  { %1337 = vmatpush.bf16.msra.mxu3 %v3311_v47  ;;  %v128_v47 = vpack.c.bf16 %v120_v43, %v112_v42 }
  0x6d   :  { %1296 = vmatpush.bf16.msra.mxu0 %v3286_v48 }
  0x6e   :  { %1310 = vmatpush.bf16.msra.mxu1 %v3294_v49 }
  0x6f   :  { %1324 = vmatpush.bf16.msra.mxu2 %v3302_v50 }
  0x70   :  { %1338 = vmatpush.bf16.msra.mxu3 %v3310_v51 }
  0x71   :  { %1297 = vmatpush.bf16.msra.mxu0 %v3285_v52 }
  0x72   :  { %1311 = vmatpush.bf16.msra.mxu1 %v3293_v53 }
  0x73   :  { %1325 = vmatpush.bf16.msra.mxu2 %v3301_v54 }
  0x74   :  { %1339 = vmatpush.bf16.msra.mxu3 %v3309_v55  ;;  %1298 = vmatmul.bf16.vlgmr.msra.gmra.mxu0 %v121_v4 }
  0x75   :  { %1346 = vmatpush.bf16.msrb.mxu0 %v3324_v56  ;;  %1312 = vmatmul.bf16.vlgmr.msra.gmra.mxu1 %v122_v6 }
  0x76   :  { %1360 = vmatpush.bf16.msrb.mxu1 %v3332_v57  ;;  %1326 = vmatmul.bf16.vlgmr.msra.gmra.mxu2 %v123_v5 }
  0x77   :  { %1374 = vmatpush.bf16.msrb.mxu2 %v3340_v2  ;;  %1340 = vmatmul.bf16.vlgmr.msra.gmra.mxu3 %v124_v7 }
  0x78   :  { %1388 = vmatpush.bf16.msrb.mxu3 %v3348_v3 }
  0x79   :  { %1347 = vmatpush.bf16.msrb.mxu0 %v3323_v8 }
  0x7a   :  { %1361 = vmatpush.bf16.msrb.mxu1 %v3331_v9 }
  0x7b   :  { %1375 = vmatpush.bf16.msrb.mxu2 %v3339_v10 }
  0x7c   :  { %1389 = vmatpush.bf16.msrb.mxu3 %v3347_v11  ;;  %v3621_v11 = vmov 0.0  }
  0x7d   :  { %1348 = vmatpush.bf16.msrb.mxu0 %v3322_v12  ;;  %103 = vst [vmem:[#allocation3] sm:$0x1] %v3621_v11 }
  0x7e   :  { %1362 = vmatpush.bf16.msrb.mxu1 %v3330_v13  ;;  %104 = vst [vmem:[#allocation4] sm:$0x1] %v3621_v11 }
  0x7f   :  { %1376 = vmatpush.bf16.msrb.mxu2 %v3338_v14 }
  0x80   :  { %1390 = vmatpush.bf16.msrb.mxu3 %v3346_v15 }
  0x81   :  { %1349 = vmatpush.bf16.msrb.mxu0 %v3321_v16 }
  0x82   :  { %1363 = vmatpush.bf16.msrb.mxu1 %v3329_v17 }
  0x83   :  { %1377 = vmatpush.bf16.msrb.mxu2 %v3337_v18 }
  0x84   :  { %1391 = vmatpush.bf16.msrb.mxu3 %v3345_v19 }
  0x85   :  { %1350 = vmatpush.bf16.msrb.mxu0 %v3320_v20 }
  0x86   :  { %1364 = vmatpush.bf16.msrb.mxu1 %v3328_v21 }
  0x87   :  { %1378 = vmatpush.bf16.msrb.mxu2 %v3336_v22 }
  0x88   :  { %1392 = vmatpush.bf16.msrb.mxu3 %v3344_v23 }
  0x89   :  { %1351 = vmatpush.bf16.msrb.mxu0 %v3319_v24 }
  0x8a   :  { %1365 = vmatpush.bf16.msrb.mxu1 %v3327_v25 }
  0x8b   :  { %1379 = vmatpush.bf16.msrb.mxu2 %v3335_v26 }
  0x8c   :  { %1393 = vmatpush.bf16.msrb.mxu3 %v3343_v27 }
  0x8d   :  { %1352 = vmatpush.bf16.msrb.mxu0 %v3318_v28 }
  0x8e   :  { %1366 = vmatpush.bf16.msrb.mxu1 %v3326_v29 }
  0x8f   :  { %1380 = vmatpush.bf16.msrb.mxu2 %v3334_v30 }
  0x90   :  { %1394 = vmatpush.bf16.msrb.mxu3 %v3342_v31 }
  0x91   :  { %1353 = vmatpush.bf16.msrb.mxu0 %v3317_v32 }
  0x92   :  { %1367 = vmatpush.bf16.msrb.mxu1 %v3325_v33 }
  0x93   :  { %1381 = vmatpush.bf16.msrb.mxu2 %v3333_v34 }
  0x94   :  { %1395 = vmatpush.bf16.msrb.mxu3 %v3341_v35  ;;  %1354 = vmatmul.bf16.vlgmr.msrb.gmra.mxu0 %v125_v44 }
  0x95   :  { %1368 = vmatmul.bf16.vlgmr.msrb.gmra.mxu1 %v126_v45 }
  0x96   :  { %1382 = vmatmul.bf16.vlgmr.msrb.gmra.mxu2 %v127_v46 }
  0x97   :  { %1396 = vmatmul.bf16.vlgmr.msrb.gmra.mxu3 %v128_v47 }
  0xb1   :  { %v803_v48 = vpop.f32.mrf.mxu0 }
  0xb2   :  { %v817_v49 = vpop.f32.mrf.mxu1 }
  0xb3   :  { %v818_v56 = vadd.f32 %v817_v49, %v803_v48 }
  0xb9   :  { %v831_v50 = vpop.f32.mrf.mxu2  ;;  %v805_v52 = vpop.f32.mrf.mxu0 }
  0xba   :  { %v845_v51 = vpop.f32.mrf.mxu3  ;;  %v819_v53 = vpop.f32.mrf.mxu1  ;;  %v832_v59 = vadd.f32 %v831_v50, %v818_v56 }
  0xbb   :  { %v820_v0 = vadd.f32 %v819_v53, %v805_v52 }
  0xbc   :  { %v846_v62 = vadd.f32 %v845_v51, %v832_v59 }
  0xc1   :  { %v833_v54 = vpop.f32.mrf.mxu2 }
  0xc2   :  { %v847_v55 = vpop.f32.mrf.mxu3  ;;  %v834_v3 = vadd.f32 %v833_v54, %v820_v0 }
  0xc4   :  { %v848_v8 = vadd.f32 %v847_v55, %v834_v3 }
  0xd1   :  { %v859_v57 = vpop.f32.mrf.mxu0 }
  0xd2   :  { %v873_v58 = vpop.f32.mrf.mxu1  ;;  %v860_v1 = vadd.f32 %v859_v57, %v846_v62 }
  0xd4   :  { %v874_v4 = vadd.f32 %v873_v58, %v860_v1  ;;  %v1406_v1 = vld [vmem:[#allocation3] sm:$0x1] }
  0xd9   :  { %v887_v60 = vpop.f32.mrf.mxu2  ;;  %v861_v63 = vpop.f32.mrf.mxu0 }
  0xda   :  { %v901_v61 = vpop.f32.mrf.mxu3  ;;  %v875_v2 = vpop.f32.mrf.mxu1  ;;  %v888_v9 = vadd.f32 %v887_v60, %v874_v4  ;;  %v862_v12 = vadd.f32 %v861_v63, %v848_v8  ;;  %v1416_v4 = vld [vmem:[#allocation4] sm:$0x1] }
  0xdc   :  { %v902_v13 = vadd.f32 %v901_v61, %v888_v9  ;;  %v876_v16 = vadd.f32 %v875_v2, %v862_v12  ;;  %v3419_v12 = vld [vmem:[#allocation10 + $0x30] sm:$0xff] }
  0xe1   :  { %v889_v5 = vpop.f32.mrf.mxu2 }
  0xe2   :  { %v903_v6 = vpop.f32.mrf.mxu3  ;;  %v890_v18 = vadd.f32 %v889_v5, %v876_v16  ;;  %v3416_v16 = vld [vmem:[#allocation10 + $0x18] sm:$0xff] }
  0xe4   :  { %v904_v22 = vadd.f32 %v903_v6, %v890_v18  ;;  %v3415_v18 = vld [vmem:[#allocation10 + $0x10] sm:$0xff] }
  0xf1   :  { %v1299_v7 = vpop.f32.mrf.mxu0 }
  0xf2   :  { %v1313_v10 = vpop.f32.mrf.mxu1  ;;  %v1300_v17 = vadd.f32 %v1299_v7, %v902_v13  ;;  %v3418_v13 = vld [vmem:[#allocation10 + $0x28] sm:$0xff] }
  0xf4   :  { %v1314_v20 = vadd.f32 %v1313_v10, %v1300_v17  ;;  %v3420_v10 = vld [vmem:[#allocation10 + $0x38] sm:$0xff] }
  0xf5   :  { %1562 = vmatpush.bf16.msra.mxu0 %v3420_v10 }
  0xf9   :  { %v1327_v14 = vpop.f32.mrf.mxu2  ;;  %v1301_v19 = vpop.f32.mrf.mxu0  ;;  %1563 = vmatpush.bf16.msra.mxu0 %v3419_v12 }
  0xfa   :  { %v1341_v15 = vpop.f32.mrf.mxu3  ;;  %v1315_v21 = vpop.f32.mrf.mxu1  ;;  %v1328_v23 = vadd.f32 %v1327_v14, %v1314_v20  ;;  %v1302_v24 = vadd.f32 %v1301_v19, %v904_v22  ;;  %v3417_v14 = vld [vmem:[#allocation10 + $0x20] sm:$0xff] }
  0xfc   :  { %v1342_v27 = vadd.f32 %v1341_v15, %v1328_v23  ;;  %v1316_v29 = vadd.f32 %v1315_v21, %v1302_v24  ;;  %v3414_v21 = vld [vmem:[#allocation10 + $0x8] sm:$0xff] }
  0xfd   :  { %1564 = vmatpush.bf16.msra.mxu0 %v3418_v13 }
 0x101   :  { %v1329_v25 = vpop.f32.mrf.mxu2  ;;  %1565 = vmatpush.bf16.msra.mxu0 %v3417_v14  ;;  %v3428_v14 = vld [vmem:[#allocation10 + $0x78] sm:$0xff] }
 0x102   :  { %v1343_v26 = vpop.f32.mrf.mxu3  ;;  %v1330_v32 = vadd.f32 %v1329_v25, %v1316_v29  ;;  %v3413_v25 = vld [vmem:[#allocation10] sm:$0xff]  ;;  %v1438_v29 = vlaneseq  ;;  %1694 = vmatpush.bf16.msra.mxu1 %v3428_v14  ;;  %v3432_v14 = vld [vmem:[#allocation10 + $0x98] sm:$0xff] }
 0x104   :  { %v1344_v36 = vadd.f32 %v1343_v26, %v1330_v32  ;;  %v1442_v32 = vand.u32 127, %v1438_v29 }
 0x105   :  { %1566 = vmatpush.bf16.msra.mxu0 %v3416_v16  ;;  %v3426_v16 = vld [vmem:[#allocation10 + $0x68] sm:$0xff] }
 0x106   :  { %vm1443_vm1 = vcmp.ge.s32.totalorder %v1442_v32, 64 }
 0x109   :  { %1567 = vmatpush.bf16.msra.mxu0 %v3415_v18 }
 0x10d   :  { %1568 = vmatpush.bf16.msra.mxu0 %v3414_v21  ;;  %v3423_v21 = vld [vmem:[#allocation10 + $0x50] sm:$0xff] }
 0x111   :  { %v1355_v28 = vpop.f32.mrf.mxu0  ;;  %1569 = vmatpush.bf16.msra.mxu0 %v3413_v25 }
 0x112   :  { %v1356_v30 = vadd.f32 %v1355_v28, %v1342_v27  ;;  %v1369_v31 = vpop.f32.mrf.mxu1 }
 0x114   :  { %v1370_v33 = vadd.f32 %v1369_v31, %v1356_v30 }
 0x119   :  { %v1383_v34 = vpop.f32.mrf.mxu2  ;;  %v1357_v38 = vpop.f32.mrf.mxu0 }
 0x11a   :  { %v1397_v35 = vpop.f32.mrf.mxu3  ;;  %v1384_v37 = vadd.f32 %v1383_v34, %v1370_v33  ;;  %v1358_v39 = vadd.f32 %v1357_v38, %v1344_v36  ;;  %v1371_v41 = vpop.f32.mrf.mxu1 }
 0x11c   :  { %v1398_v40 = vadd.f32 %v1397_v35, %v1384_v37  ;;  %v1372_v42 = vadd.f32 %v1371_v41, %v1358_v39  ;;  %v1480_v35 = vld [vmem:[%s3804_s4] sm:$0x1]  ;;  %v1439_v37 = vshrl.u32 %v1438_v29, 7  ;;  %v3622_v39 = vmov 0  }
 0x11e   :  { %v1402_v44 = vpack.c.bf16 %v1398_v40, %v1398_v40 }
 0x120   :  { %v1404_v48 = vunpack.c.l.bf16 %v1402_v44 }
 0x121   :  { %v1385_v43 = vpop.f32.mrf.mxu2 }
 0x122   :  { %v1386_v45 = vadd.f32 %v1385_v43, %v1372_v42  ;;  %v1399_v46 = vpop.f32.mrf.mxu3  ;;  %v1417_v52 = vmul.f32 %v1404_v48, %v1404_v48  ;;  %v1482_v42 = vld [vmem:[%s3805_s5] sm:$0x1] }
 0x124   :  { %v1400_v47 = vadd.f32 %v1399_v46, %v1386_v45 }
 0x126   :  { %v1403_v49 = vpack.c.bf16 %v1400_v47, %v1400_v47  ;;  %v3688_v50 = vpack.c.bf16 %v1400_v47, %v1398_v40  ;;  %v1444_v40 = vsel %vm1443_vm1, 16, %v3622_v39 }
 0x127   :  { %v1445_v45 = vadd.s32 %v1444_v40, %v1439_v37  ;;  %v1615_v40 = vld [vmem:[%s3805_s5 + $0x1] sm:$0x1] }
 0x128   :  { %v1405_v51 = vunpack.c.l.bf16 %v1403_v49  ;;  %v3484_v46 = vunpack.c.l.bf16 %v3688_v50  ;;  %v3485_v47 = vunpack.c.h.bf16 %v3688_v50 }
 0x129   :  { %vm1447_vm4 = vcmp.lt.s32.totalorder %v1445_v45, 8 }
 0x12a   :  { %v1407_v53 = vadd.f32 %v1405_v51, %v1404_v48  ;;  %v1418_v54 = vmul.f32 %v1405_v51, %v1405_v51 }
 0x12c   :  { %v1408_v55 = vrot.slane %v1407_v53, 4  ;;  %v1419_v56 = vadd.f32 %v1418_v54, %v1417_v52 }
 0x12e   :  { %v1409_v57 = vadd.f32 %v1408_v55, %v1407_v53  ;;  %v1420_v58 = vrot.slane %v1419_v56, 4  ;;  %v3701_v55 = vsel %vm1447_vm4, 1.0, %v3621_v11 }
 0x130   :  { %v1410_v59 = vrot.slane %v1409_v57, 2  ;;  %v1421_v60 = vadd.f32 %v1420_v58, %v1419_v56 }
 0x132   :  { %v1411_v61 = vadd.f32 %v1410_v59, %v1409_v57  ;;  %v1422_v62 = vrot.slane %v1421_v60, 2 }
 0x134   :  { %v1412_v63 = vrot.slane %v1411_v61, 1  ;;  %v1423_v0 = vadd.f32 %v1422_v62, %v1421_v60 }
 0x136   :  { %v1413_v2 = vadd.f32 %v1412_v63, %v1411_v61  ;;  %v1424_v3 = vrot.slane %v1423_v0, 1 }
 0x138   :  { %v1414_v5 = vadd.f32 %v1413_v2, %v1406_v1  ;;  %v1425_v6 = vadd.f32 %v1424_v3, %v1423_v0 }
 0x13a   :  { %1415 = vst [vmem:[#allocation3] sm:$0x1] %v1414_v5  ;;  %v1426_v7 = vadd.f32 %v1425_v6, %v1416_v4 }
 0x13c   :  { %1427 = vst [vmem:[#allocation4] sm:$0x1] %v1426_v7 }
 0x141   :  { %v1457_v8 = vld [vmem:[#allocation3] sm:$0x1] }
 0x142   :  { %1459 = vrot.lane.b32.xlu0 %v1457_v8, %s3616_s12 }
 0x143   :  { %v1458_v9 = vld [vmem:[#allocation4] sm:$0x1] }
 0x14a   :  { %1463 = vrot.lane.b32.xlu0 %v1458_v9, %s3616_s12 }
 0x1b4   :  { %v1460_v15 = vpop.permute.xlu0 %1459 }
 0x1b5   :  { %v1461_v17 = vadd.f32 %v1460_v15, %v1457_v8  ;;  %v3427_v15 = vld [vmem:[#allocation10 + $0x70] sm:$0xff] }
 0x1b6   :  { %1695 = vmatpush.bf16.msra.mxu1 %v3427_v15 }
 0x1b7   :  { %v1462_v19 = vmul.f32 0.125, %v1461_v17  ;;  %v3425_v17 = vld [vmem:[#allocation10 + $0x60] sm:$0xff] }
 0x1b9   :  { %v1467_v23 = vmul.f32 %v1462_v19, %v1462_v19 }
 0x1ba   :  { %1696 = vmatpush.bf16.msra.mxu1 %v3426_v16  ;;  %v3431_v16 = vld [vmem:[#allocation10 + $0x90] sm:$0xff] }
 0x1bc   :  { %v1464_v20 = vpop.permute.xlu0 %1463 }
 0x1bd   :  { %v1465_v22 = vadd.f32 %v1464_v20, %v1458_v9 }
 0x1be   :  { %1697 = vmatpush.bf16.msra.mxu1 %v3425_v17 }
 0x1bf   :  { %v1466_v24 = vmul.f32 0.125, %v1465_v22 }
 0x1c1   :  { %v1468_v26 = vsub.f32 %v1466_v24, %v1467_v23  ;;  %v3422_v24 = vld [vmem:[#allocation10 + $0x48] sm:$0xff] }
 0x1c3   :  { %v1469_v27 = vadd.f32 1e-05, %v1468_v26 }
 0x1c5   :  { %3496 = vrsqrt.f32 %v1469_v27  ;;  %vm1476_vm2 = vweird.f32 %v1469_v27 }
 0x1cb   :  { %v3497_v28 = vpop.eup %3496 }
 0x1cc   :  { %v1471_v30 = vmul.f32 %v3497_v28, %v1469_v27  ;;  %vm1477_vm0 = vweird.f32 %v3497_v28 }
 0x1cd   :  { %vm1478_vm3 = vmor %vm1476_vm2, %vm1477_vm0 }
 0x1ce   :  { %v1472_v31 = vmul.f32 %v3497_v28, %v1471_v30 }
 0x1d0   :  { %v1473_v33 = vmul.f32 0.5, %v1472_v31 }
 0x1d2   :  { %v1474_v34 = vsub.f32 1.5, %v1473_v33 }
 0x1d4   :  { %v1475_v36 = vmul.f32 %v3497_v28, %v1474_v34 }
 0x1d6   :  { %v1479_v38 = vsel %vm1478_vm3, %v3497_v28, %v1475_v36  ;;  %v3421_v28 = vld [vmem:[#allocation10 + $0x40] sm:$0xff]  ;;  %v1613_v36 = vld [vmem:[%s3804_s4 + $0x1] sm:$0x1] }
 0x1d7   :  { %v1481_v41 = vmul.f32 %v1480_v35, %v1479_v38 }
 0x1d9   :  { %v1483_v43 = vmul.f32 %v1481_v41, %v1462_v19  ;;  %v1486_v44 = vperm.slane %v1481_v41, 0  ;;  %v3424_v19 = vld [vmem:[#allocation10 + $0x58] sm:$0xff] }
 0x1da   :  { %1698 = vmatpush.bf16.msra.mxu1 %v3424_v19  ;;  %v3430_v19 = vld [vmem:[#allocation10 + $0x88] sm:$0xff] }
 0x1db   :  { %v1484_v48 = vsub.f32 %v1482_v42, %v1483_v43  ;;  %v1488_v49 = vmul.f32 %v3484_v46, %v1486_v44  ;;  %v1489_v51 = vmul.f32 %v3485_v47, %v1486_v44 }
 0x1dd   :  { %v1490_v52 = vperm.slane %v1484_v48, 0 }
 0x1de   :  { %1699 = vmatpush.bf16.msra.mxu1 %v3423_v21 }
 0x1df   :  { %v1491_v53 = vadd.f32 %v1490_v52, %v1488_v49  ;;  %v1492_v54 = vadd.f32 %v1490_v52, %v1489_v51 }
 0x1e1   :  { %v1493_v56 = vmax.f32 %v1491_v53, 0.0  ;;  %v1494_v57 = vmax.f32 %v1492_v54, 0.0 }
 0x1e2   :  { %1700 = vmatpush.bf16.msra.mxu1 %v3422_v24 }
 0x1e3   :  { %v1495_v58 = vmul.f32 %v3701_v55, %v1493_v56  ;;  %v1496_v59 = vmul.f32 0.0, %v1494_v57 }
 0x1e5   :  { %v1497_v60 = vpack.c.bf16 %v1496_v59, %v1495_v58 }
 0x1e6   :  { %1701 = vmatpush.bf16.msra.mxu1 %v3421_v28 }
 0x1e7   :  { %1570 = vmatmul.bf16.vlgmr.msra.gmra.mxu0 %v1497_v60 }
 0x264   :  { %v1571_v61 = vpop.f32.mrf.mxu0 }
 0x265   :  { %v1583_v50 = vmul.f32 %v1571_v61, %v1571_v61 }
 0x26c   :  { %v1573_v62 = vpop.f32.mrf.mxu0 }
 0x26d   :  { %v1576_v63 = vadd.f32 %v1573_v62, %v1571_v61  ;;  %v1584_v0 = vmul.f32 %v1573_v62, %v1573_v62 }
 0x26f   :  { %v1577_v1 = vrot.slane %v1576_v63, 4  ;;  %v1585_v2 = vadd.f32 %v1584_v0, %v1583_v50 }
 0x271   :  { %v1578_v3 = vadd.f32 %v1577_v1, %v1576_v63  ;;  %v1586_v4 = vrot.slane %v1585_v2, 4 }
 0x273   :  { %v1579_v5 = vrot.slane %v1578_v3, 2  ;;  %v1587_v6 = vadd.f32 %v1586_v4, %v1585_v2 }
 0x275   :  { %v1580_v11 = vadd.f32 %v1579_v5, %v1578_v3  ;;  %v1588_v7 = vrot.slane %v1587_v6, 2 }
 0x277   :  { %v1581_v8 = vrot.slane %v1580_v11, 1  ;;  %v1589_v10 = vadd.f32 %v1588_v7, %v1587_v6 }
 0x279   :  { %v1582_v9 = vadd.f32 %v1581_v8, %v1580_v11  ;;  %v1590_v12 = vrot.slane %v1589_v10, 1  ;;  %v3436_v8 = vld [vmem:[#allocation10 + $0xb8] sm:$0xff] }
 0x27a   :  { %1826 = vmatpush.bf16.msra.mxu2 %v3436_v8  ;;  %v3439_v8 = vld [vmem:[#allocation10 + $0xd0] sm:$0xff] }
 0x27b   :  { %1592 = vrot.lane.b32.xlu1 %v1582_v9, %s3616_s12  ;;  %v1591_v13 = vadd.f32 %v1590_v12, %v1589_v10  ;;  %v3434_v10 = vld [vmem:[#allocation10 + $0xa8] sm:$0xff]  ;;  %v3433_v12 = vld [vmem:[#allocation10 + $0xa0] sm:$0xff] }
 0x283   :  { %1596 = vrot.lane.b32.xlu1 %v1591_v13, %s3616_s12 }
 0x2ed   :  { %v1593_v18 = vpop.permute.xlu1 %1592 }
 0x2ee   :  { %v1594_v20 = vadd.f32 %v1593_v18, %v1582_v9  ;;  %v3435_v9 = vld [vmem:[#allocation10 + $0xb0] sm:$0xff] }
 0x2ef   :  { %1827 = vmatpush.bf16.msra.mxu2 %v3435_v9 }
 0x2f0   :  { %v1595_v22 = vmul.f32 0.125, %v1594_v20 }
 0x2f2   :  { %v1600_v26 = vmul.f32 %v1595_v22, %v1595_v22 }
 0x2f3   :  { %1828 = vmatpush.bf16.msra.mxu2 %v3434_v10 }
 0x2f5   :  { %v1597_v23 = vpop.permute.xlu1 %1596 }
 0x2f6   :  { %v1598_v25 = vadd.f32 %v1597_v23, %v1591_v13  ;;  %v3429_v23 = vld [vmem:[#allocation10 + $0x80] sm:$0xff] }
 0x2f7   :  { %1829 = vmatpush.bf16.msra.mxu2 %v3433_v12 }
 0x2f8   :  { %v1599_v27 = vmul.f32 0.125, %v1598_v25 }
 0x2fa   :  { %v1601_v29 = vsub.f32 %v1599_v27, %v1600_v26 }
 0x2fb   :  { %1830 = vmatpush.bf16.msra.mxu2 %v3432_v14 }
 0x2fc   :  { %v1602_v30 = vadd.f32 1e-05, %v1601_v29 }
 0x2fe   :  { %3498 = vrsqrt.f32 %v1602_v30  ;;  %vm1609_vm6 = vweird.f32 %v1602_v30 }
 0x2ff   :  { %1831 = vmatpush.bf16.msra.mxu2 %v3431_v16 }
 0x303   :  { %1832 = vmatpush.bf16.msra.mxu2 %v3430_v19 }
 0x304   :  { %v3499_v31 = vpop.eup %3498 }
 0x305   :  { %v1604_v32 = vmul.f32 %v3499_v31, %v1602_v30  ;;  %vm1610_vm5 = vweird.f32 %v3499_v31 }
 0x306   :  { %vm1611_vm7 = vmor %vm1609_vm6, %vm1610_vm5 }
 0x307   :  { %v1605_v33 = vmul.f32 %v3499_v31, %v1604_v32  ;;  %1833 = vmatpush.bf16.msra.mxu2 %v3429_v23 }
 0x309   :  { %v1606_v34 = vmul.f32 0.5, %v1605_v33 }
 0x30b   :  { %v1607_v35 = vsub.f32 1.5, %v1606_v34 }
 0x30d   :  { %v1608_v37 = vmul.f32 %v3499_v31, %v1607_v35  ;;  %v1747_v35 = vld [vmem:[%s3805_s5 + $0x2] sm:$0x1] }
 0x30f   :  { %v1612_v38 = vsel %vm1611_vm7, %v3499_v31, %v1608_v37  ;;  %v1745_v31 = vld [vmem:[%s3804_s4 + $0x2] sm:$0x1] }
 0x310   :  { %v1614_v39 = vmul.f32 %v1613_v36, %v1612_v38 }
 0x312   :  { %v1616_v41 = vmul.f32 %v1614_v39, %v1595_v22  ;;  %v1618_v42 = vperm.slane %v1614_v39, 0 }
 0x314   :  { %v1617_v43 = vsub.f32 %v1615_v40, %v1616_v41  ;;  %v1619_v44 = vmul.f32 %v1618_v42, %v1571_v61  ;;  %v1620_v45 = vmul.f32 %v1618_v42, %v1573_v62 }
 0x316   :  { %v1621_v46 = vperm.slane %v1617_v43, 0 }
 0x318   :  { %v1622_v47 = vadd.f32 %v1621_v46, %v1619_v44  ;;  %v1623_v48 = vadd.f32 %v1621_v46, %v1620_v45 }
 0x31a   :  { %v1624_v49 = vmax.f32 %v1622_v47, 0.0  ;;  %v1625_v51 = vmax.f32 %v1623_v48, 0.0 }
 0x31c   :  { %v1626_v52 = vmul.f32 %v3701_v55, %v1624_v49  ;;  %v1627_v53 = vmul.f32 0.0, %v1625_v51 }
 0x31e   :  { %v1628_v54 = vpack.c.bf16 %v1627_v53, %v1626_v52 }
 0x320   :  { %1702 = vmatmul.bf16.vlgmr.msra.gmra.mxu1 %v1628_v54 }
 0x39d   :  { %v1703_v56 = vpop.f32.mrf.mxu1 }
 0x39e   :  { %v1715_v58 = vmul.f32 %v1703_v56, %v1703_v56 }
 0x3a5   :  { %v1705_v57 = vpop.f32.mrf.mxu1 }
 0x3a6   :  { %v1708_v59 = vadd.f32 %v1705_v57, %v1703_v56  ;;  %v1716_v60 = vmul.f32 %v1705_v57, %v1705_v57 }
 0x3a8   :  { %v1709_v50 = vrot.slane %v1708_v59, 4  ;;  %v1717_v63 = vadd.f32 %v1716_v60, %v1715_v58 }
 0x3aa   :  { %v1710_v0 = vadd.f32 %v1709_v50, %v1708_v59  ;;  %v1718_v61 = vrot.slane %v1717_v63, 4 }
 0x3ac   :  { %v1711_v62 = vrot.slane %v1710_v0, 2  ;;  %v1719_v1 = vadd.f32 %v1718_v61, %v1717_v63 }
 0x3ae   :  { %v1712_v2 = vadd.f32 %v1711_v62, %v1710_v0  ;;  %v1720_v3 = vrot.slane %v1719_v1, 2 }
 0x3b0   :  { %v1713_v4 = vrot.slane %v1712_v2, 1  ;;  %v1721_v6 = vadd.f32 %v1720_v3, %v1719_v1 }
 0x3b2   :  { %v1714_v5 = vadd.f32 %v1713_v4, %v1712_v2  ;;  %v1722_v11 = vrot.slane %v1721_v6, 1  ;;  %v3444_v4 = vld [vmem:[#allocation10 + $0xf8] sm:$0xff] }
 0x3b3   :  { %1958 = vmatpush.bf16.msra.mxu3 %v3444_v4  ;;  %v3448_v4 = vld [vmem:[#allocation10 + $0x118] sm:$0xff] }
 0x3b4   :  { %1724 = vrot.lane.b32.xlu2 %v1714_v5, %s3616_s12  ;;  %v1723_v7 = vadd.f32 %v1722_v11, %v1721_v6  ;;  %v3442_v6 = vld [vmem:[#allocation10 + $0xe8] sm:$0xff]  ;;  %v3441_v11 = vld [vmem:[#allocation10 + $0xe0] sm:$0xff] }
 0x3bc   :  { %1728 = vrot.lane.b32.xlu2 %v1723_v7, %s3616_s12 }
 0x40e   :  { %v1725_v13 = vpop.permute.xlu2 %1724 }
 0x40f   :  { %v1726_v15 = vadd.f32 %v1725_v13, %v1714_v5  ;;  %v3443_v5 = vld [vmem:[#allocation10 + $0xf0] sm:$0xff]  ;;  %v3438_v13 = vld [vmem:[#allocation10 + $0xc8] sm:$0xff] }
 0x410   :  { %1959 = vmatpush.bf16.msra.mxu3 %v3443_v5 }
 0x411   :  { %v1727_v17 = vmul.f32 0.125, %v1726_v15 }
 0x413   :  { %v1732_v21 = vmul.f32 %v1727_v17, %v1727_v17 }
 0x414   :  { %1960 = vmatpush.bf16.msra.mxu3 %v3442_v6  ;;  %v3447_v6 = vld [vmem:[#allocation10 + $0x110] sm:$0xff] }
 0x416   :  { %v1729_v18 = vpop.permute.xlu2 %1728 }
 0x417   :  { %v1730_v20 = vadd.f32 %v1729_v18, %v1723_v7  ;;  %v3440_v7 = vld [vmem:[#allocation10 + $0xd8] sm:$0xff]  ;;  %v3437_v18 = vld [vmem:[#allocation10 + $0xc0] sm:$0xff] }
 0x418   :  { %1961 = vmatpush.bf16.msra.mxu3 %v3441_v11 }
 0x419   :  { %v1731_v22 = vmul.f32 0.125, %v1730_v20 }
 0x41b   :  { %v1733_v24 = vsub.f32 %v1731_v22, %v1732_v21 }
 0x41c   :  { %1962 = vmatpush.bf16.msra.mxu3 %v3440_v7 }
 0x41d   :  { %v1734_v25 = vadd.f32 1e-05, %v1733_v24 }
 0x41f   :  { %3500 = vrsqrt.f32 %v1734_v25  ;;  %vm1741_vm9 = vweird.f32 %v1734_v25 }
 0x420   :  { %1963 = vmatpush.bf16.msra.mxu3 %v3439_v8  ;;  %v3446_v8 = vld [vmem:[#allocation10 + $0x108] sm:$0xff] }
 0x424   :  { %1964 = vmatpush.bf16.msra.mxu3 %v3438_v13  ;;  %v3445_v13 = vld [vmem:[#allocation10 + $0x100] sm:$0xff] }
 0x425   :  { %v3501_v26 = vpop.eup %3500 }
 0x426   :  { %v1736_v27 = vmul.f32 %v3501_v26, %v1734_v25  ;;  %vm1742_vm8 = vweird.f32 %v3501_v26 }
 0x427   :  { %vm1743_vm10 = vmor %vm1741_vm9, %vm1742_vm8 }
 0x428   :  { %v1737_v28 = vmul.f32 %v3501_v26, %v1736_v27  ;;  %1965 = vmatpush.bf16.msra.mxu3 %v3437_v18 }
 0x42a   :  { %v1738_v29 = vmul.f32 0.5, %v1737_v28 }
 0x42c   :  { %v1739_v30 = vsub.f32 1.5, %v1738_v29 }
 0x42e   :  { %v1740_v32 = vmul.f32 %v3501_v26, %v1739_v30  ;;  %v1879_v30 = vld [vmem:[%s3805_s5 + $0x3] sm:$0x1] }
 0x430   :  { %v1744_v33 = vsel %vm1743_vm10, %v3501_v26, %v1740_v32  ;;  %v1877_v26 = vld [vmem:[%s3804_s4 + $0x3] sm:$0x1]  ;;  %vm2503_vm10 = vcmask 15360  }
 0x431   :  { %v1746_v34 = vmul.f32 %v1745_v31, %v1744_v33 }
 0x433   :  { %v1748_v36 = vmul.f32 %v1746_v34, %v1727_v17  ;;  %v1750_v37 = vperm.slane %v1746_v34, 0 }
 0x435   :  { %v1749_v38 = vsub.f32 %v1747_v35, %v1748_v36  ;;  %v1751_v39 = vmul.f32 %v1750_v37, %v1703_v56  ;;  %v1752_v40 = vmul.f32 %v1750_v37, %v1705_v57 }
 0x437   :  { %v1753_v41 = vperm.slane %v1749_v38, 0 }
 0x439   :  { %v1754_v42 = vadd.f32 %v1753_v41, %v1751_v39  ;;  %v1755_v43 = vadd.f32 %v1753_v41, %v1752_v40 }
 0x43b   :  { %v1756_v44 = vmax.f32 %v1754_v42, 0.0  ;;  %v1757_v45 = vmax.f32 %v1755_v43, 0.0 }
 0x43d   :  { %v1758_v46 = vmul.f32 %v3701_v55, %v1756_v44  ;;  %v1759_v47 = vmul.f32 0.0, %v1757_v45 }
 0x43f   :  { %v1760_v48 = vpack.c.bf16 %v1759_v47, %v1758_v46 }
 0x441   :  { %1834 = vmatmul.bf16.vlgmr.msra.gmra.mxu2 %v1760_v48 }
 0x4c4   :  { %v1835_v49 = vpop.f32.mrf.mxu2 }
 0x4c5   :  { %v1847_v52 = vmul.f32 %v1835_v49, %v1835_v49 }
 0x4cc   :  { %v1837_v51 = vpop.f32.mrf.mxu2 }
 0x4cd   :  { %v1840_v53 = vadd.f32 %v1837_v51, %v1835_v49  ;;  %v1848_v54 = vmul.f32 %v1837_v51, %v1837_v51 }
 0x4cf   :  { %v1841_v58 = vrot.slane %v1840_v53, 4  ;;  %v1849_v59 = vadd.f32 %v1848_v54, %v1847_v52 }
 0x4d1   :  { %v1842_v60 = vadd.f32 %v1841_v58, %v1840_v53  ;;  %v1850_v56 = vrot.slane %v1849_v59, 4 }
 0x4d3   :  { %v1843_v57 = vrot.slane %v1842_v60, 2  ;;  %v1851_v50 = vadd.f32 %v1850_v56, %v1849_v59 }
 0x4d5   :  { %v1844_v63 = vadd.f32 %v1843_v57, %v1842_v60  ;;  %v1852_v0 = vrot.slane %v1851_v50, 2 }
 0x4d7   :  { %v1845_v61 = vrot.slane %v1844_v63, 1  ;;  %v1853_v62 = vadd.f32 %v1852_v0, %v1851_v50 }
 0x4d9   :  { %v1846_v1 = vadd.f32 %v1845_v61, %v1844_v63  ;;  %v1854_v2 = vrot.slane %v1853_v62, 1  ;;  %v3452_v61 = vld [vmem:[#allocation10 + $0x138] sm:$0xff] }
 0x4da   :  { %2090 = vmatpush.bf16.msrb.mxu0 %v3452_v61 }
 0x4db   :  { %1856 = vrot.lane.b32.xlu0 %v1846_v1, %s3616_s12  ;;  %v1855_v3 = vadd.f32 %v1854_v2, %v1853_v62  ;;  %v3451_v62 = vld [vmem:[#allocation10 + $0x130] sm:$0xff]  ;;  %v3449_v2 = vld [vmem:[#allocation10 + $0x120] sm:$0xff] }
 0x4dd   :  { %1860 = vrot.lane.b32.xlu1 %v1855_v3, %s3616_s12 }
 0x4de   :  { %2091 = vmatpush.bf16.msrb.mxu0 %v3451_v62 }
 0x54d   :  { %v1857_v9 = vpop.permute.xlu0 %1856 }
 0x54e   :  { %v1858_v10 = vadd.f32 %v1857_v9, %v1846_v1  ;;  %v3450_v1 = vld [vmem:[#allocation10 + $0x128] sm:$0xff] }
 0x54f   :  { %v1861_v12 = vpop.permute.xlu1 %1860  ;;  %2092 = vmatpush.bf16.msrb.mxu0 %v3450_v1  ;;  %v3455_v1 = vld [vmem:[#allocation10 + $0x150] sm:$0xff] }
 0x550   :  { %v1859_v14 = vmul.f32 0.125, %v1858_v10  ;;  %v1862_v15 = vadd.f32 %v1861_v12, %v1855_v3 }
 0x552   :  { %v1864_v16 = vmul.f32 %v1859_v14, %v1859_v14  ;;  %v1863_v17 = vmul.f32 0.125, %v1862_v15 }
 0x553   :  { %2093 = vmatpush.bf16.msrb.mxu0 %v3449_v2 }
 0x554   :  { %v1865_v19 = vsub.f32 %v1863_v17, %v1864_v16 }
 0x556   :  { %v1866_v20 = vadd.f32 1e-05, %v1865_v19 }
 0x557   :  { %2094 = vmatpush.bf16.msrb.mxu0 %v3448_v4 }
 0x558   :  { %3502 = vrsqrt.f32 %v1866_v20  ;;  %vm1873_vm12 = vweird.f32 %v1866_v20 }
 0x55b   :  { %2095 = vmatpush.bf16.msrb.mxu0 %v3447_v6 }
 0x55e   :  { %v3503_v21 = vpop.eup %3502 }
 0x55f   :  { %v1868_v22 = vmul.f32 %v3503_v21, %v1866_v20  ;;  %vm1874_vm11 = vweird.f32 %v3503_v21  ;;  %2096 = vmatpush.bf16.msrb.mxu0 %v3446_v8  ;;  %v3453_v8 = vld [vmem:[#allocation10 + $0x140] sm:$0xff] }
 0x560   :  { %vm1875_vm13 = vmor %vm1873_vm12, %vm1874_vm11 }
 0x561   :  { %v1869_v23 = vmul.f32 %v3503_v21, %v1868_v22 }
 0x563   :  { %v1870_v24 = vmul.f32 0.5, %v1869_v23  ;;  %2097 = vmatpush.bf16.msrb.mxu0 %v3445_v13 }
 0x565   :  { %v1871_v25 = vsub.f32 1.5, %v1870_v24 }
 0x567   :  { %v1872_v27 = vmul.f32 %v3503_v21, %v1871_v25  ;;  %v2011_v25 = vld [vmem:[%s3805_s5 + $0x4] sm:$0x1] }
 0x569   :  { %v1876_v28 = vsel %vm1875_vm13, %v3503_v21, %v1872_v27  ;;  %v2009_v21 = vld [vmem:[%s3804_s4 + $0x4] sm:$0x1] }
 0x56a   :  { %v1878_v29 = vmul.f32 %v1877_v26, %v1876_v28 }
 0x56c   :  { %v1880_v31 = vmul.f32 %v1878_v29, %v1859_v14  ;;  %v1882_v32 = vperm.slane %v1878_v29, 0 }
 0x56e   :  { %v1881_v33 = vsub.f32 %v1879_v30, %v1880_v31  ;;  %v1883_v34 = vmul.f32 %v1882_v32, %v1835_v49  ;;  %v1884_v35 = vmul.f32 %v1882_v32, %v1837_v51 }
 0x570   :  { %v1885_v36 = vperm.slane %v1881_v33, 0 }
 0x572   :  { %v1886_v37 = vadd.f32 %v1885_v36, %v1883_v34  ;;  %v1887_v38 = vadd.f32 %v1885_v36, %v1884_v35 }
 0x574   :  { %v1888_v39 = vmax.f32 %v1886_v37, 0.0  ;;  %v1889_v40 = vmax.f32 %v1887_v38, 0.0 }
 0x576   :  { %v1890_v41 = vmul.f32 %v3701_v55, %v1888_v39  ;;  %v1891_v42 = vmul.f32 0.0, %v1889_v40 }
 0x578   :  { %v1892_v43 = vpack.c.bf16 %v1891_v42, %v1890_v41 }
 0x57a   :  { %1966 = vmatmul.bf16.vlgmr.msra.gmra.mxu3 %v1892_v43 }
 0x5fd   :  { %v1967_v44 = vpop.f32.mrf.mxu3 }
 0x5fe   :  { %v1979_v46 = vmul.f32 %v1967_v44, %v1967_v44 }
 0x605   :  { %v1969_v45 = vpop.f32.mrf.mxu3 }
 0x606   :  { %v1972_v47 = vadd.f32 %v1969_v45, %v1967_v44  ;;  %v1980_v48 = vmul.f32 %v1969_v45, %v1969_v45 }
 0x608   :  { %v1973_v52 = vrot.slane %v1972_v47, 4  ;;  %v1981_v53 = vadd.f32 %v1980_v48, %v1979_v46 }
 0x60a   :  { %v1974_v54 = vadd.f32 %v1973_v52, %v1972_v47  ;;  %v1982_v49 = vrot.slane %v1981_v53, 4 }
 0x60c   :  { %v1975_v51 = vrot.slane %v1974_v54, 2  ;;  %v1983_v58 = vadd.f32 %v1982_v49, %v1981_v53 }
 0x60e   :  { %v1976_v59 = vadd.f32 %v1975_v51, %v1974_v54  ;;  %v1984_v60 = vrot.slane %v1983_v58, 2 }
 0x610   :  { %v1977_v56 = vrot.slane %v1976_v59, 1  ;;  %v1985_v57 = vadd.f32 %v1984_v60, %v1983_v58 }
 0x612   :  { %v1978_v50 = vadd.f32 %v1977_v56, %v1976_v59  ;;  %v1986_v63 = vrot.slane %v1985_v57, 1  ;;  %v3460_v56 = vld [vmem:[#allocation10 + $0x178] sm:$0xff] }
 0x613   :  { %2222 = vmatpush.bf16.msrb.mxu1 %v3460_v56  ;;  %v3463_v56 = vld [vmem:[#allocation10 + $0x190] sm:$0xff] }
 0x614   :  { %1988 = vrot.lane.b32.xlu2 %v1978_v50, %s3616_s12  ;;  %v1987_v0 = vadd.f32 %v1986_v63, %v1985_v57  ;;  %v3459_v57 = vld [vmem:[#allocation10 + $0x170] sm:$0xff]  ;;  %v3457_v63 = vld [vmem:[#allocation10 + $0x160] sm:$0xff] }
 0x616   :  { %1992 = vrot.lane.b32.xlu0 %v1987_v0, %s3616_s12 }
 0x617   :  { %2223 = vmatpush.bf16.msrb.mxu1 %v3459_v57 }
 0x66e   :  { %v1989_v3 = vpop.permute.xlu2 %1988 }
 0x66f   :  { %v1990_v5 = vadd.f32 %v1989_v3, %v1978_v50  ;;  %v3458_v50 = vld [vmem:[#allocation10 + $0x168] sm:$0xff] }
 0x670   :  { %2224 = vmatpush.bf16.msrb.mxu1 %v3458_v50 }
 0x671   :  { %v1991_v11 = vmul.f32 0.125, %v1990_v5  ;;  %v3454_v5 = vld [vmem:[#allocation10 + $0x148] sm:$0xff] }
 0x673   :  { %v1996_v10 = vmul.f32 %v1991_v11, %v1991_v11 }
 0x674   :  { %2225 = vmatpush.bf16.msrb.mxu1 %v3457_v63 }
 0x688   :  { %v1993_v7 = vpop.permute.xlu0 %1992 }
 0x689   :  { %v1994_v9 = vadd.f32 %v1993_v7, %v1987_v0  ;;  %v3456_v0 = vld [vmem:[#allocation10 + $0x158] sm:$0xff] }
 0x68a   :  { %2226 = vmatpush.bf16.msrb.mxu1 %v3456_v0  ;;  %v3462_v0 = vld [vmem:[#allocation10 + $0x188] sm:$0xff] }
 0x68b   :  { %v1995_v12 = vmul.f32 0.125, %v1994_v9 }
 0x68d   :  { %v1997_v14 = vsub.f32 %v1995_v12, %v1996_v10 }
 0x68e   :  { %2227 = vmatpush.bf16.msrb.mxu1 %v3455_v1 }
 0x68f   :  { %v1998_v15 = vadd.f32 1e-05, %v1997_v14 }
 0x691   :  { %3504 = vrsqrt.f32 %v1998_v15  ;;  %vm2005_vm15 = vweird.f32 %v1998_v15 }
 0x692   :  { %2228 = vmatpush.bf16.msrb.mxu1 %v3454_v5 }
 0x696   :  { %2229 = vmatpush.bf16.msrb.mxu1 %v3453_v8 }
 0x697   :  { %v3505_v16 = vpop.eup %3504 }
 0x698   :  { %v2000_v17 = vmul.f32 %v3505_v16, %v1998_v15  ;;  %vm2006_vm14 = vweird.f32 %v3505_v16 }
 0x699   :  { %vm2007_vm0 = vmor %vm2005_vm15, %vm2006_vm14 }
 0x69a   :  { %v2001_v18 = vmul.f32 %v3505_v16, %v2000_v17 }
 0x69c   :  { %v2002_v19 = vmul.f32 0.5, %v2001_v18 }
 0x69e   :  { %v2003_v20 = vsub.f32 1.5, %v2002_v19 }
 0x6a0   :  { %v2004_v22 = vmul.f32 %v3505_v16, %v2003_v20  ;;  %v2143_v20 = vld [vmem:[%s3805_s5 + $0x5] sm:$0x1] }
 0x6a2   :  { %v2008_v23 = vsel %vm2007_vm0, %v3505_v16, %v2004_v22  ;;  %v2141_v16 = vld [vmem:[%s3804_s4 + $0x5] sm:$0x1] }
 0x6a3   :  { %v2010_v24 = vmul.f32 %v2009_v21, %v2008_v23 }
 0x6a5   :  { %v2012_v26 = vmul.f32 %v2010_v24, %v1991_v11  ;;  %v2014_v27 = vperm.slane %v2010_v24, 0 }
 0x6a7   :  { %v2013_v28 = vsub.f32 %v2011_v25, %v2012_v26  ;;  %v2015_v29 = vmul.f32 %v2014_v27, %v1967_v44  ;;  %v2016_v30 = vmul.f32 %v2014_v27, %v1969_v45 }
 0x6a9   :  { %v2017_v31 = vperm.slane %v2013_v28, 0 }
 0x6ab   :  { %v2018_v32 = vadd.f32 %v2017_v31, %v2015_v29  ;;  %v2019_v33 = vadd.f32 %v2017_v31, %v2016_v30 }
 0x6ad   :  { %v2020_v34 = vmax.f32 %v2018_v32, 0.0  ;;  %v2021_v35 = vmax.f32 %v2019_v33, 0.0 }
 0x6af   :  { %v2022_v36 = vmul.f32 %v3701_v55, %v2020_v34  ;;  %v2023_v37 = vmul.f32 0.0, %v2021_v35 }
 0x6b1   :  { %v2024_v38 = vpack.c.bf16 %v2023_v37, %v2022_v36 }
 0x6b3   :  { %2098 = vmatmul.bf16.vlgmr.msrb.gmra.mxu0 %v2024_v38 }
 0x730   :  { %v2099_v39 = vpop.f32.mrf.mxu0 }
 0x731   :  { %v2111_v41 = vmul.f32 %v2099_v39, %v2099_v39 }
 0x738   :  { %v2101_v40 = vpop.f32.mrf.mxu0 }
 0x739   :  { %v2104_v42 = vadd.f32 %v2101_v40, %v2099_v39  ;;  %v2112_v43 = vmul.f32 %v2101_v40, %v2101_v40 }
 0x73b   :  { %v2105_v46 = vrot.slane %v2104_v42, 4  ;;  %v2113_v47 = vadd.f32 %v2112_v43, %v2111_v41 }
 0x73d   :  { %v2106_v48 = vadd.f32 %v2105_v46, %v2104_v42  ;;  %v2114_v44 = vrot.slane %v2113_v47, 4 }
 0x73f   :  { %v2107_v45 = vrot.slane %v2106_v48, 2  ;;  %v2115_v52 = vadd.f32 %v2114_v44, %v2113_v47 }
 0x741   :  { %v2108_v53 = vadd.f32 %v2107_v45, %v2106_v48  ;;  %v2116_v54 = vrot.slane %v2115_v52, 2 }
 0x743   :  { %v2109_v49 = vrot.slane %v2108_v53, 1  ;;  %v2117_v51 = vadd.f32 %v2116_v54, %v2115_v52 }
 0x745   :  { %v2110_v58 = vadd.f32 %v2109_v49, %v2108_v53  ;;  %v2118_v59 = vrot.slane %v2117_v51, 1  ;;  %v3468_v49 = vld [vmem:[#allocation10 + $0x1b8] sm:$0xff] }
 0x746   :  { %2354 = vmatpush.bf16.msrb.mxu2 %v3468_v49  ;;  %v3472_v49 = vld [vmem:[%s3806_s6 + $0x18] sm:$0xff] }
 0x747   :  { %2120 = vrot.lane.b32.xlu1 %v2110_v58, %s3616_s12  ;;  %v2119_v60 = vadd.f32 %v2118_v59, %v2117_v51  ;;  %v3467_v51 = vld [vmem:[#allocation10 + $0x1b0] sm:$0xff]  ;;  %v3465_v59 = vld [vmem:[#allocation10 + $0x1a0] sm:$0xff] }
 0x749   :  { %2124 = vrot.lane.b32.xlu2 %v2119_v60, %s3616_s12 }
 0x74a   :  { %2355 = vmatpush.bf16.msrb.mxu2 %v3467_v51 }
 0x7a3   :  { %v2125_v61 = vpop.permute.xlu2 %2124 }
 0x7a4   :  { %v2126_v2 = vadd.f32 %v2125_v61, %v2119_v60  ;;  %v3464_v60 = vld [vmem:[#allocation10 + $0x198] sm:$0xff] }
 0x7a6   :  { %v2127_v6 = vmul.f32 0.125, %v2126_v2 }
 0x7b9   :  { %v2121_v62 = vpop.permute.xlu1 %2120 }
 0x7ba   :  { %v2122_v3 = vadd.f32 %v2121_v62, %v2110_v58  ;;  %v3466_v58 = vld [vmem:[#allocation10 + $0x1a8] sm:$0xff] }
 0x7bb   :  { %2356 = vmatpush.bf16.msrb.mxu2 %v3466_v58  ;;  %v3471_v58 = vld [vmem:[%s3806_s6 + $0x10] sm:$0xff] }
 0x7bc   :  { %v2123_v4 = vmul.f32 0.125, %v2122_v3  ;;  %v3461_v3 = vld [vmem:[#allocation10 + $0x180] sm:$0xff] }
 0x7be   :  { %v2128_v11 = vmul.f32 %v2123_v4, %v2123_v4 }
 0x7bf   :  { %2357 = vmatpush.bf16.msrb.mxu2 %v3465_v59 }
 0x7c0   :  { %v2129_v7 = vsub.f32 %v2127_v6, %v2128_v11 }
 0x7c2   :  { %v2130_v9 = vadd.f32 1e-05, %v2129_v7 }
 0x7c3   :  { %2358 = vmatpush.bf16.msrb.mxu2 %v3464_v60 }
 0x7c4   :  { %3506 = vrsqrt.f32 %v2130_v9  ;;  %vm2137_vm2 = vweird.f32 %v2130_v9 }
 0x7c7   :  { %2359 = vmatpush.bf16.msrb.mxu2 %v3463_v56  ;;  %v3470_v56 = vld [vmem:[%s3806_s6 + $0x8] sm:$0xff] }
 0x7ca   :  { %v3507_v10 = vpop.eup %3506 }
 0x7cb   :  { %v2132_v12 = vmul.f32 %v3507_v10, %v2130_v9  ;;  %vm2138_vm1 = vweird.f32 %v3507_v10  ;;  %2360 = vmatpush.bf16.msrb.mxu2 %v3462_v0  ;;  %v3469_v0 = vld [vmem:[%s3806_s6] sm:$0xff] }
 0x7cc   :  { %vm2139_vm3 = vmor %vm2137_vm2, %vm2138_vm1 }
 0x7cd   :  { %v2133_v13 = vmul.f32 %v3507_v10, %v2132_v12 }
 0x7cf   :  { %v2134_v14 = vmul.f32 0.5, %v2133_v13  ;;  %2361 = vmatpush.bf16.msrb.mxu2 %v3461_v3 }
 0x7d1   :  { %v2135_v15 = vsub.f32 1.5, %v2134_v14 }
 0x7d3   :  { %v2136_v17 = vmul.f32 %v3507_v10, %v2135_v15  ;;  %v2275_v15 = vld [vmem:[%s3805_s5 + $0x6] sm:$0x1] }
 0x7d5   :  { %v2140_v18 = vsel %vm2139_vm3, %v3507_v10, %v2136_v17  ;;  %v2273_v10 = vld [vmem:[%s3804_s4 + $0x6] sm:$0x1] }
 0x7d6   :  { %v2142_v19 = vmul.f32 %v2141_v16, %v2140_v18 }
 0x7d8   :  { %v2144_v21 = vmul.f32 %v2142_v19, %v2123_v4  ;;  %v2146_v22 = vperm.slane %v2142_v19, 0 }
 0x7da   :  { %v2145_v23 = vsub.f32 %v2143_v20, %v2144_v21  ;;  %v2147_v24 = vmul.f32 %v2146_v22, %v2099_v39  ;;  %v2148_v25 = vmul.f32 %v2146_v22, %v2101_v40 }
 0x7dc   :  { %v2149_v26 = vperm.slane %v2145_v23, 0 }
 0x7de   :  { %v2150_v27 = vadd.f32 %v2149_v26, %v2147_v24  ;;  %v2151_v28 = vadd.f32 %v2149_v26, %v2148_v25 }
 0x7e0   :  { %v2152_v29 = vmax.f32 %v2150_v27, 0.0  ;;  %v2153_v30 = vmax.f32 %v2151_v28, 0.0 }
 0x7e2   :  { %v2155_v31 = vmul.f32 0.0, %v2153_v30  ;;  %v2154_v32 = vmul.f32 %v3701_v55, %v2152_v29 }
 0x7e4   :  { %v2156_v33 = vpack.c.bf16 %v2155_v31, %v2154_v32 }
 0x7e6   :  { %2230 = vmatmul.bf16.vlgmr.msrb.gmra.mxu1 %v2156_v33 }
 0x863   :  { %v2231_v34 = vpop.f32.mrf.mxu1 }
 0x864   :  { %v2243_v36 = vmul.f32 %v2231_v34, %v2231_v34 }
 0x86b   :  { %v2233_v35 = vpop.f32.mrf.mxu1 }
 0x86c   :  { %v2236_v37 = vadd.f32 %v2233_v35, %v2231_v34  ;;  %v2244_v38 = vmul.f32 %v2233_v35, %v2233_v35 }
 0x86e   :  { %v2237_v41 = vrot.slane %v2236_v37, 4  ;;  %v2245_v42 = vadd.f32 %v2244_v38, %v2243_v36 }
 0x870   :  { %v2238_v43 = vadd.f32 %v2237_v41, %v2236_v37  ;;  %v2246_v39 = vrot.slane %v2245_v42, 4 }
 0x872   :  { %v2239_v40 = vrot.slane %v2238_v43, 2  ;;  %v2247_v46 = vadd.f32 %v2246_v39, %v2245_v42 }
 0x874   :  { %v2240_v47 = vadd.f32 %v2239_v40, %v2238_v43  ;;  %v2248_v48 = vrot.slane %v2247_v46, 2 }
 0x876   :  { %v2241_v44 = vrot.slane %v2240_v47, 1  ;;  %v2249_v45 = vadd.f32 %v2248_v48, %v2247_v46 }
 0x878   :  { %v2242_v52 = vadd.f32 %v2241_v44, %v2240_v47  ;;  %v2250_v53 = vrot.slane %v2249_v45, 1  ;;  %v3476_v44 = vld [vmem:[%s3806_s6 + $0x38] sm:$0xff] }
 0x879   :  { %2489 = vmatpush.bf16.msrb.mxu3 %v3476_v44 }
 0x87a   :  { %2252 = vrot.lane.b32.xlu0 %v2242_v52, %s3616_s12  ;;  %v2251_v54 = vadd.f32 %v2250_v53, %v2249_v45  ;;  %v3475_v45 = vld [vmem:[%s3806_s6 + $0x30] sm:$0xff]  ;;  %v3473_v53 = vld [vmem:[%s3806_s6 + $0x20] sm:$0xff] }
 0x87c   :  { %2256 = vrot.lane.b32.xlu1 %v2251_v54, %s3616_s12 }
 0x87d   :  { %2490 = vmatpush.bf16.msrb.mxu3 %v3475_v45 }
 0x8ec   :  { %v2253_v57 = vpop.permute.xlu0 %2252 }
 0x8ed   :  { %v2254_v50 = vadd.f32 %v2253_v57, %v2242_v52  ;;  %v3474_v52 = vld [vmem:[%s3806_s6 + $0x28] sm:$0xff] }
 0x8ee   :  { %v2257_v63 = vpop.permute.xlu1 %2256  ;;  %2491 = vmatpush.bf16.msrb.mxu3 %v3474_v52 }
 0x8ef   :  { %v2255_v61 = vmul.f32 0.125, %v2254_v50  ;;  %v2258_v62 = vadd.f32 %v2257_v63, %v2251_v54 }
 0x8f1   :  { %v2260_v1 = vmul.f32 %v2255_v61, %v2255_v61  ;;  %v2259_v2 = vmul.f32 0.125, %v2258_v62 }
 0x8f2   :  { %2492 = vmatpush.bf16.msrb.mxu3 %v3473_v53 }
 0x8f3   :  { %v2261_v4 = vsub.f32 %v2259_v2, %v2260_v1 }
 0x8f5   :  { %v2262_v5 = vadd.f32 1e-05, %v2261_v4 }
 0x8f6   :  { %2493 = vmatpush.bf16.msrb.mxu3 %v3472_v49 }
 0x8f7   :  { %3508 = vrsqrt.f32 %v2262_v5  ;;  %vm2269_vm5 = vweird.f32 %v2262_v5 }
 0x8fa   :  { %2494 = vmatpush.bf16.msrb.mxu3 %v3471_v58 }
 0x8fd   :  { %v3509_v6 = vpop.eup %3508 }
 0x8fe   :  { %v2264_v11 = vmul.f32 %v3509_v6, %v2262_v5  ;;  %vm2270_vm4 = vweird.f32 %v3509_v6  ;;  %2495 = vmatpush.bf16.msrb.mxu3 %v3470_v56 }
 0x8ff   :  { %vm2271_vm6 = vmor %vm2269_vm5, %vm2270_vm4 }
 0x900   :  { %v2265_v7 = vmul.f32 %v3509_v6, %v2264_v11 }
 0x902   :  { %v2266_v8 = vmul.f32 0.5, %v2265_v7  ;;  %2496 = vmatpush.bf16.msrb.mxu3 %v3469_v0 }
 0x904   :  { %v2267_v9 = vsub.f32 1.5, %v2266_v8 }
 0x906   :  { %v2268_v12 = vmul.f32 %v3509_v6, %v2267_v9  ;;  %v2407_v9 = vld [vmem:[%s3805_s5 + $0x7] sm:$0x1] }
 0x908   :  { %v2272_v13 = vsel %vm2271_vm6, %v3509_v6, %v2268_v12  ;;  %v2405_v6 = vld [vmem:[%s3804_s4 + $0x7] sm:$0x1] }
 0x909   :  { %v2274_v14 = vmul.f32 %v2273_v10, %v2272_v13 }
 0x90b   :  { %v2276_v16 = vmul.f32 %v2274_v14, %v2255_v61  ;;  %v2278_v17 = vperm.slane %v2274_v14, 0 }
 0x90d   :  { %v2277_v18 = vsub.f32 %v2275_v15, %v2276_v16  ;;  %v2279_v19 = vmul.f32 %v2278_v17, %v2231_v34  ;;  %v2280_v20 = vmul.f32 %v2278_v17, %v2233_v35 }
 0x90f   :  { %v2281_v21 = vperm.slane %v2277_v18, 0 }
 0x911   :  { %v2282_v22 = vadd.f32 %v2281_v21, %v2279_v19  ;;  %v2283_v23 = vadd.f32 %v2281_v21, %v2280_v20 }
 0x913   :  { %v2284_v24 = vmax.f32 %v2282_v22, 0.0  ;;  %v2285_v25 = vmax.f32 %v2283_v23, 0.0 }
 0x915   :  { %v2286_v26 = vmul.f32 %v3701_v55, %v2284_v24  ;;  %v2287_v27 = vmul.f32 0.0, %v2285_v25  ;;  %v3495_v24 = vld [vmem:[%s3807_s7] ss:$0 sm:$0xff] }
 0x917   :  { %v2288_v28 = vpack.c.bf16 %v2287_v27, %v2286_v26 }
 0x919   :  { %2362 = vmatmul.bf16.vlgmr.msrb.gmra.mxu2 %v2288_v28 }
 0x99c   :  { %v2363_v29 = vpop.f32.mrf.mxu2 }
 0x99d   :  { %v2375_v31 = vmul.f32 %v2363_v29, %v2363_v29 }
 0x9a4   :  { %v2365_v30 = vpop.f32.mrf.mxu2 }
 0x9a5   :  { %v2368_v32 = vadd.f32 %v2365_v30, %v2363_v29  ;;  %v2376_v33 = vmul.f32 %v2365_v30, %v2365_v30 }
 0x9a7   :  { %v2369_v36 = vrot.slane %v2368_v32, 4  ;;  %v2377_v37 = vadd.f32 %v2376_v33, %v2375_v31 }
 0x9a9   :  { %v2370_v38 = vadd.f32 %v2369_v36, %v2368_v32  ;;  %v2378_v34 = vrot.slane %v2377_v37, 4 }
 0x9ab   :  { %v2371_v35 = vrot.slane %v2370_v38, 2  ;;  %v2379_v41 = vadd.f32 %v2378_v34, %v2377_v37 }
 0x9ad   :  { %v2372_v42 = vadd.f32 %v2371_v35, %v2370_v38  ;;  %v2380_v43 = vrot.slane %v2379_v41, 2 }
 0x9af   :  { %v2373_v39 = vrot.slane %v2372_v42, 1  ;;  %v2381_v40 = vadd.f32 %v2380_v43, %v2379_v41 }
 0x9b1   :  { %v2374_v46 = vadd.f32 %v2373_v39, %v2372_v42  ;;  %v2382_v47 = vrot.slane %v2381_v40, 1 }
 0x9b3   :  { %2384 = vrot.lane.b32.xlu2 %v2374_v46, %s3616_s12  ;;  %v2383_v48 = vadd.f32 %v2382_v47, %v2381_v40 }
 0x9b5   :  { %2388 = vrot.lane.b32.xlu0 %v2383_v48, %s3616_s12 }
 0xa0d   :  { %v2385_v54 = vpop.permute.xlu2 %2384 }
 0xa0e   :  { %v2386_v51 = vadd.f32 %v2385_v54, %v2374_v46 }
 0xa10   :  { %v2387_v59 = vmul.f32 0.125, %v2386_v51 }
 0xa12   :  { %v2392_v50 = vmul.f32 %v2387_v59, %v2387_v59 }
 0xa27   :  { %v2389_v60 = vpop.permute.xlu0 %2388 }
 0xa28   :  { %v2390_v57 = vadd.f32 %v2389_v60, %v2383_v48 }
 0xa2a   :  { %v2391_v63 = vmul.f32 0.125, %v2390_v57 }
 0xa2c   :  { %v2393_v61 = vsub.f32 %v2391_v63, %v2392_v50 }
 0xa2e   :  { %v2394_v62 = vadd.f32 1e-05, %v2393_v61 }
 0xa30   :  { %3510 = vrsqrt.f32 %v2394_v62  ;;  %vm2401_vm8 = vweird.f32 %v2394_v62 }
 0xa36   :  { %v3511_v1 = vpop.eup %3510 }
 0xa37   :  { %v2396_v2 = vmul.f32 %v3511_v1, %v2394_v62  ;;  %vm2402_vm7 = vweird.f32 %v3511_v1 }
 0xa38   :  { %vm2403_vm9 = vmor %vm2401_vm8, %vm2402_vm7 }
 0xa39   :  { %v2397_v3 = vmul.f32 %v3511_v1, %v2396_v2 }
 0xa3b   :  { %v2398_v4 = vmul.f32 0.5, %v2397_v3 }
 0xa3d   :  { %v2399_v5 = vsub.f32 1.5, %v2398_v4 }
 0xa3f   :  { %v2400_v11 = vmul.f32 %v3511_v1, %v2399_v5 }
 0xa41   :  { %v2404_v7 = vsel %vm2403_vm9, %v3511_v1, %v2400_v11 }
 0xa42   :  { %v2406_v8 = vmul.f32 %v2405_v6, %v2404_v7 }
 0xa44   :  { %v2408_v10 = vmul.f32 %v2406_v8, %v2387_v59  ;;  %v2410_v12 = vperm.slane %v2406_v8, 0 }
 0xa46   :  { %v2409_v13 = vsub.f32 %v2407_v9, %v2408_v10  ;;  %v2411_v14 = vmul.f32 %v2410_v12, %v2363_v29  ;;  %v2412_v15 = vmul.f32 %v2410_v12, %v2365_v30 }
 0xa48   :  { %v2413_v16 = vperm.slane %v2409_v13, 0 }
 0xa4a   :  { %v2414_v17 = vadd.f32 %v2413_v16, %v2411_v14  ;;  %v2415_v18 = vadd.f32 %v2413_v16, %v2412_v15 }
 0xa4c   :  { %v2416_v19 = vmax.f32 %v2414_v17, 0.0  ;;  %v2417_v20 = vmax.f32 %v2415_v18, 0.0 }
 0xa4e   :  { %v2418_v21 = vmul.f32 %v3701_v55, %v2416_v19  ;;  %v2419_v22 = vmul.f32 0.0, %v2417_v20 }
 0xa50   :  { %v2420_v23 = vpack.c.bf16 %v2419_v22, %v2418_v21 }
 0xa52   :  { %2497 = vmatmul.bf16.vlgmr.msrb.gmra.mxu3 %v2420_v23 }
 0xad5   :  { %v2498_v25 = vpop.f32.mrf.mxu3 }
 0xad6   :  { %v2499_v26 = vadd.f32 %v3495_v24, %v2498_v25 }
 0xad8   :  { %2504 = vst.msk [vmem:[%s3808_s8] sm:$0xff] %vm2503_vm10, %v2499_v26 }
 0xadd   :  { %v2500_v27 = vpop.f32.mrf.mxu3 }
 0xade   :  { %v2501_v28 = vadd.f32 %v3495_v24, %v2500_v27 }
 0xae0   :  { %2505 = vst.msk [vmem:[%s3808_s8 + $0x8] sm:$0xff] %vm2503_vm10, %v2501_v28 }
 0xae1   :  { %2510 = vsyncpa [#allocation6], 1 }
 0xae2   :  { %2511 = vsyncpa [#allocation8], 1 }
 0xae3   :  { %2512 = vsyncpa [#allocation11], 1 }

</bundles_post_ra>
